<compile_context>
chip_gen: v6e
topology: v6e:2x2x1
jax: 0.10.0
libtpu: 0.0.40
codegen_flags: <defaults>
</compile_context>

<pallas_src>
import functools
import math
from typing import Optional, Sequence

import jax
import jax.numpy as jnp
from jax.experimental import pallas as pl
from jax.experimental.pallas import tpu as pltpu


# ----------------------------------------------------------------------------
# Generation-aware VMEM budgets
# ----------------------------------------------------------------------------
@functools.lru_cache(maxsize=1)
def _vmem_budgets():
    """Returns (per-step tile budget bytes, vmem_limit_bytes)."""
    cap = 64 * 1024 * 1024  # conservative default (v7x physical VMEM)
    try:
        info = pltpu.get_tpu_info()
        cap = int(getattr(info, "vmem_capacity_bytes", cap)) or cap
    except Exception:
        pass
    # Double-buffered (in + out + smap) working set ~= 2x tile; leave headroom.
    vmem_limit = min((cap * 3) // 4, 64 * 1024 * 1024)   # v7x: 48 MiB, v5e/v6e: 64 MiB
    tile_budget = vmem_limit // 4                         # v7x: 12 MiB, v5e/v6e: 16 MiB
    return tile_budget, vmem_limit


def _cdiv(a: int, b: int) -> int:
    return -(-a // b)


def _fits_full_image(C: int, HW: int, itemsize: int, tile_budget: int) -> bool:
    per_elem = 2 * C * itemsize + 4            # img in + out + f32 smap
    if itemsize < 4:
        per_elem += 4 * C                      # f32 temp for the in-kernel mean reduce
    return HW * per_elem <= tile_budget


def _choose_spatial_block(C: int, HW: int, itemsize: int, tile_budget: int):
    """Returns (s_blk, padded_HW) for the tiled blend kernel."""
    per_elem = 2 * C * itemsize + 4
    max_elems = max(128, tile_budget // per_elem)
    if HW <= max_elems:
        return HW, HW
    # Prefer an exact multiple-of-128 divisor of HW (no padding, no copy).
    best_div = 0
    if HW % 128 == 0:
        for m in range(min(max_elems // 128, HW // 128), 0, -1):
            if HW % (128 * m) == 0:
                best_div = 128 * m
                break
    if best_div * 4 >= min(max_elems, HW):
        return best_div, HW
    # Otherwise pad the flattened spatial axis up to a multiple of a large,
    # load-balanced block (tiny divisor blocks would be per-step-overhead bound).
    s_blk_max = max(128, (max_elems // 128) * 128)
    n_blocks = _cdiv(HW, s_blk_max)
    s_blk = _cdiv(_cdiv(HW, n_blocks), 128) * 128
    return s_blk, n_blocks * s_blk


# ----------------------------------------------------------------------------
# Exact quantile via bitwise rank-select on monotone int32 keys
# ----------------------------------------------------------------------------
def _i32(pattern: int):
    """int32 constant from a 32-bit bit pattern (handles the sign bit)."""
    pattern &= 0xFFFFFFFF
    if pattern >= 0x80000000:
        pattern -= 1 << 32
    return jnp.int32(pattern)


def _flip_nonsign(b):
    """Involution mapping f32 bit patterns <-> order-monotone int32 keys."""
    return jnp.where(b < 0, jnp.bitwise_xor(b, _i32(0x7FFFFFFF)), b)


def _rank_select(keys, rank: int):
    """keys: (..., M) monotone int32 keys. Returns (..., 1) key at ascending
    0-indexed rank `rank` (exact, duplicates handled), via a 32-step binary
    search on the key bits: one compare + lane-reduce per bit."""
    sign = _i32(0x80000000)
    ans_u = jnp.zeros(keys.shape[:-1] + (1,), jnp.int32)   # "unsigned" bit pattern
    for bit in range(31, -1, -1):
        cand_u = jnp.bitwise_or(ans_u, _i32(1 << bit))
        scand = jnp.bitwise_xor(cand_u, sign)              # back to signed key domain
        cnt = jnp.sum((keys < scand).astype(jnp.int32), axis=-1, keepdims=True)
        ans_u = jnp.where(cnt <= rank, cand_u, ans_u)
    return jnp.bitwise_xor(ans_u, sign)


def _quantile_from_keys(keys, rank: int, frac: float, bits_to_f32):
    """Linear-interpolated quantile (np.quantile 'linear') from int32 keys."""
    k_lo = _rank_select(keys, rank)
    v_lo = bits_to_f32(_flip_nonsign(k_lo))
    if frac <= 0.0:
        return v_lo
    cnt_le = jnp.sum((keys <= k_lo).astype(jnp.int32), axis=-1, keepdims=True)
    k_gt_min = jnp.min(jnp.where(keys > k_lo, keys, _i32(0x7FFFFFFF)),
                       axis=-1, keepdims=True)
    k_hi = jnp.where(cnt_le >= rank + 2, k_lo, k_gt_min)   # rank r+1 order statistic
    v_hi = bits_to_f32(_flip_nonsign(k_hi))
    return v_lo + jnp.float32(frac) * (v_hi - v_lo)


def _threshold_kernel(smap_ref, thr_ref, *, rank, frac):
    """Per-image exact quantile; smap block (1, 1, HW) resident in VMEM."""
    hw = smap_ref.shape[-1]
    smap = smap_ref[...].reshape(1, hw)
    keys = _flip_nonsign(pltpu.bitcast(smap, jnp.int32))
    thr = _quantile_from_keys(keys, rank, frac,
                              lambda b: pltpu.bitcast(b, jnp.float32))
    thr_ref[...] = thr.reshape(1, 1, 1)


@functools.partial(jax.jit, static_argnames=("rank", "frac", "vmem_limit"))
def _threshold_pallas(smap3, *, rank, frac, vmem_limit):
    N, _, HW = smap3.shape
    return pl.pallas_call(
        functools.partial(_threshold_kernel, rank=rank, frac=frac),
        out_shape=jax.ShapeDtypeStruct((N, 1, 1), jnp.float32),
        grid=(N,),
        in_specs=[pl.BlockSpec((1, 1, HW), lambda n: (n, 0, 0))],
        out_specs=pl.BlockSpec((1, 1, 1), lambda n: (n, 0, 0)),
        compiler_params=pltpu.CompilerParams(
            dimension_semantics=("parallel",),
            vmem_limit_bytes=vmem_limit),
    )(smap3)


@functools.partial(jax.jit, static_argnames=("rank", "frac"))
def _threshold_jnp(smap2, *, rank, frac):
    """jnp fallback (same exact bit-search) for huge per-image saliency maps."""
    keys = _flip_nonsign(jax.lax.bitcast_convert_type(smap2, jnp.int32))
    thr = _quantile_from_keys(
        keys, rank, frac, lambda b: jax.lax.bitcast_convert_type(b, jnp.float32))
    return thr[:, 0]


# ----------------------------------------------------------------------------
# Blend kernels (HBM-bandwidth bound: compare + select only)
# ----------------------------------------------------------------------------
def _roar_blend_full_kernel(thr_ref, img_ref, smap_ref, out_ref):
    """Whole-image block; per-image spatial mean accumulated in f32 in-kernel."""
    thr = thr_ref[pl.program_id(0)]                       # scalar f32 (SMEM)
    img = img_ref[...]                                    # (1, C, HW)
    smap = smap_ref[...]                                  # (1, 1, HW) f32
    hw = img.shape[2]
    mean = (jnp.sum(img, axis=2, keepdims=True, dtype=jnp.float32)
            * jnp.float32(1.0 / hw)).astype(img.dtype)    # (1, C, 1)
    out_ref[...] = jnp.where(smap > thr, mean, img)


def _roar_blend_tiled_kernel(thr_ref, img_ref, smap_ref, mean_ref, out_ref):
    """Spatially tiled blend; mean supplied as a tiny (1, C, 1) VMEM block."""
    thr = thr_ref[pl.program_id(0)]                       # scalar f32 (SMEM)
    out_ref[...] = jnp.where(smap_ref[...] > thr, mean_ref[...], img_ref[...])


@functools.partial(jax.jit, static_argnames=("vmem_limit",))
def _perturb_full(img3, smap3, thr, *, vmem_limit):
    N, C, HW = img3.shape
    grid_spec = pltpu.PrefetchScalarGridSpec(
        num_scalar_prefetch=1,
        grid=(N,),
        in_specs=[
            pl.BlockSpec((1, C, HW), lambda n, thr: (n, 0, 0)),
            pl.BlockSpec((1, 1, HW), lambda n, thr: (n, 0, 0)),
        ],
        out_specs=pl.BlockSpec((1, C, HW), lambda n, thr: (n, 0, 0)),
    )
    return pl.pallas_call(
        _roar_blend_full_kernel,
        out_shape=jax.ShapeDtypeStruct((N, C, HW), img3.dtype),
        grid_spec=grid_spec,
        compiler_params=pltpu.CompilerParams(
            dimension_semantics=("parallel",),
            vmem_limit_bytes=vmem_limit),
    )(thr, img3, smap3)


@functools.partial(jax.jit, static_argnames=("s_blk", "vmem_limit"))
def _perturb_tiled(img3, smap3, thr, mean, *, s_blk, vmem_limit):
    N, C, HW = img3.shape
    n_s = HW // s_blk
    # Grid-constant mean block when a single (1, C, 1) mean is shared by all
    # images (fixed-mean path): DMA'd once, resident for the whole kernel.
    if mean.shape[0] == 1:
        mean_idx = lambda n, s, thr: (0, 0, 0)
    else:
        mean_idx = lambda n, s, thr: (n, 0, 0)
    grid_spec = pltpu.PrefetchScalarGridSpec(
        num_scalar_prefetch=1,
        grid=(N, n_s),
        in_specs=[
            pl.BlockSpec((1, C, s_blk), lambda n, s, thr: (n, 0, s)),
            pl.BlockSpec((1, 1, s_blk), lambda n, s, thr: (n, 0, s)),
            pl.BlockSpec((1, C, 1), mean_idx),
        ],
        out_specs=pl.BlockSpec((1, C, s_blk), lambda n, s, thr: (n, 0, s)),
    )
    return pl.pallas_call(
        _roar_blend_tiled_kernel,
        out_shape=jax.ShapeDtypeStruct((N, C, HW), img3.dtype),
        grid_spec=grid_spec,
        compiler_params=pltpu.CompilerParams(
            dimension_semantics=("parallel", "parallel"),
            vmem_limit_bytes=vmem_limit),
    )(thr, img3, smap3, mean)


# ----------------------------------------------------------------------------
# Module-equivalent wrapper
# ----------------------------------------------------------------------------
class RoarPerturbationPallas:
    def __init__(self, top_fraction: float,
                 mean: Optional[Sequence[float]] = None) -> None:
        if top_fraction < 0 or top_fraction > 1:
            raise ValueError(
                f"top_fraction should be in the interval [0, 1], "
                f"but got {top_fraction} .")
        self.quantile = 1.0 - top_fraction
        self._mean = (jnp.asarray(mean, dtype=jnp.float32)
                      if mean is not None else None)
        self._has_mean = mean is not None

    def __call__(self, img: jax.Array, smap: jax.Array) -> jax.Array:
        return self.perturb(img, smap)

    # -- quantile rank / interpolation weight (np.quantile 'linear') ---------
    def _rank_frac(self, M: int):
        q = self.quantile
        if q <= 0.0:
            return 0, 0.0
        if q >= 1.0:
            return M - 1, 0.0
        p = q * (M - 1)
        rank = int(math.floor(p))
        frac = float(p - rank)
        if rank >= M - 1:
            return M - 1, 0.0
        return rank, frac

    def perturb(self, img: jax.Array, smap: jax.Array) -> jax.Array:
        img = jnp.asarray(img)
        if not jnp.issubdtype(img.dtype, jnp.floating):
            img = img.astype(jnp.float32)
        smap = jnp.asarray(smap, jnp.float32)          # threshold/compare in f32
        N, C, H, W = img.shape
        HW = H * W
        tile_budget, vmem_limit = _vmem_budgets()

        # Lane-dense layout: flattened spatial axis on the lane dimension.
        img3 = img.reshape(N, C, HW)
        smap3 = smap.reshape(N, 1, HW)

        # ---- per-image threshold (exact quantile, single HBM read of smap) --
        rank, frac = self._rank_frac(HW)
        if HW * 24 <= vmem_limit:
            thr = _threshold_pallas(smap3, rank=rank, frac=frac,
                                    vmem_limit=vmem_limit).reshape(N)
        else:
            thr = _threshold_jnp(smap.reshape(N, HW), rank=rank, frac=frac)
        if self.quantile == 0.0:
            thr = thr - 1e-08
        thr = thr.astype(jnp.float32)

        # ---- blend ----------------------------------------------------------
        itemsize = jnp.dtype(img.dtype).itemsize
        if self._has_mean:
            if self._mean.shape[0] != C:
                raise ValueError(
                    f"mean has {self._mean.shape[0]} channels, img has {C}.")
            mean_arr = self._mean.astype(img.dtype).reshape(1, C, 1)
        elif _fits_full_image(C, HW, itemsize, tile_budget):
            # Whole image fits the VMEM tile budget: compute the spatial mean
            # in-kernel (img is read from HBM exactly once).
            # TODO(synk): for N == 1 on multi-TensorCore chips (v7x) this uses a
            # single grid step; a spatial split would need a second img pass.
            out3 = _perturb_full(img3, smap3, thr, vmem_limit=vmem_limit)
            return out3.reshape(N, C, H, W)
        else:
            # Large image: precompute the per-image mean (f32 accumulate) so the
            # blend kernel can be spatially tiled.
            mean_arr = (jnp.sum(img3, axis=2, keepdims=True, dtype=jnp.float32)
                        * (1.0 / HW)).astype(img.dtype)

        s_blk, padded_hw = _choose_spatial_block(C, HW, itemsize, tile_budget)
        if padded_hw != HW:
            pad = padded_hw - HW
            img3_k = jnp.pad(img3, ((0, 0), (0, 0), (0, pad)))
            smap3_k = jnp.pad(smap3, ((0, 0), (0, 0), (0, pad)))
        else:
            img3_k, smap3_k = img3, smap3

        out3 = _perturb_tiled(img3_k, smap3_k, thr, mean_arr,
                              s_blk=s_blk, vmem_limit=vmem_limit)
        if padded_hw != HW:
            out3 = out3[:, :, :HW]
        return out3.reshape(N, C, H, W)


# ----------------------------------------------------------------------------
# Pure-JAX reference (for verification)
# ----------------------------------------------------------------------------
def _reference(img, smap, top_fraction, mean=None):
    img = jnp.asarray(img, jnp.float32)
    smap = jnp.asarray(smap, jnp.float32)
    q = 1.0 - top_fraction
    thr = jnp.quantile(smap, q, axis=(1, 2), keepdims=True)
    if q == 0.0:
        thr = thr - 1e-08
    mask = (smap > thr).astype(img.dtype)[:, None, :, :]
    if mean is None:
        m = jnp.mean(img, axis=(2, 3), keepdims=True)
    else:
        m = jnp.asarray(mean, jnp.float32).reshape(1, -1, 1, 1)
    return m * mask + img * (1.0 - mask)


if __name__ == "__main__":
    key = jax.random.PRNGKey(0)
    k_img, k_smap, k_img2, k_smap2 = jax.random.split(key, 4)

    N, C, H, W = 2, 4, 16, 16
    img = jax.random.normal(k_img, (N, C, H, W), dtype=jnp.float32)
    smap = jax.random.uniform(k_smap, (N, H, W), dtype=jnp.float32)

    # Case 1: no mean provided -> per-image spatial mean computed in-kernel.
    pert = RoarPerturbationPallas(top_fraction=0.3)
    out = jax.block_until_ready(pert(img, smap))
    ref = _reference(img, smap, 0.3)
    assert out.shape == (N, C, H, W)
    assert jnp.allclose(out, ref, rtol=1e-5, atol=1e-5)

    # Case 2: fixed per-channel mean -> tiled blend with grid-constant mean.
    mean_vals = [0.485, 0.456, 0.406, 0.5]
    pert_m = RoarPerturbationPallas(top_fraction=0.5, mean=mean_vals)
    out_m = jax.block_until_ready(pert_m(img, smap))
    ref_m = _reference(img, smap, 0.5, mean=mean_vals)
    assert jnp.allclose(out_m, ref_m, rtol=1e-5, atol=1e-5)

    # Case 3: odd spatial size (HW not a multiple of 128), fixed mean.
    H2, W2 = 15, 15
    img2 = jax.random.normal(k_img2, (N, C, H2, W2), dtype=jnp.float32)
    smap2 = jax.random.uniform(k_smap2, (N, H2, W2), dtype=jnp.float32)
    out2 = jax.block_until_ready(pert_m(img2, smap2))
    ref2 = _reference(img2, smap2, 0.5, mean=mean_vals)
    assert jnp.allclose(out2, ref2, rtol=1e-5, atol=1e-5)

    # Case 4: top_fraction = 1.0 (quantile == 0 path, threshold - 1e-8).
    pert_all = RoarPerturbationPallas(top_fraction=1.0)
    out_a = jax.block_until_ready(pert_all(img, smap))
    ref_a = _reference(img, smap, 1.0)
    assert jnp.allclose(out_a, ref_a, rtol=1e-5, atol=1e-5)

    print("KERNEL_OK")
</pallas_src>

<mosaic_0001>
module attributes {stable_mosaic.version = 11 : i64} {
  func.func @_threshold_kernel(%arg0: i32, %arg1: memref<1x1x256xf32, #tpu.memory_space<vmem>>, %arg2: memref<1x1x1xf32, #tpu.memory_space<vmem>>) attributes {dimension_semantics = [#tpu.dimension_semantics<parallel>], iteration_bounds = array<i64: 2>, scalar_prefetch = 0 : i64, scratch_operands = 0 : i64, tpu.core_type = #tpu.core_type<tc>, window_params = [{transform_indices = @transform_0, window_bounds = array<i64: 1, 1, 256>}, {transform_indices = @transform_1, window_bounds = array<i64: 1, 1, 1>}]} {
    %c0 = arith.constant 0 : index
    %c0_0 = arith.constant 0 : index
    %c0_1 = arith.constant 0 : index
    %0 = vector.load %arg1[%c0, %c0_0, %c0_1] : memref<1x1x256xf32, #tpu.memory_space<vmem>>, vector<1x1x256xf32>
    %1 = vector.shape_cast %0 : vector<1x1x256xf32> to vector<1x256xf32>
    %2 = tpu.bitcast %1 : vector<1x256xf32> -> vector<1x256xi32>
    %c0_i32 = arith.constant 0 : i32
    %3 = vector.broadcast %c0_i32 : i32 to vector<1x256xi32>
    %4 = arith.cmpi slt, %2, %3 : vector<1x256xi32>
    %c2147483647_i32 = arith.constant 2147483647 : i32
    %5 = vector.broadcast %c2147483647_i32 : i32 to vector<1x256xi32>
    %6 = arith.xori %2, %5 : vector<1x256xi32>
    %7 = arith.select %4, %6, %2 : vector<1x256xi1>, vector<1x256xi32>
    %c0_i32_2 = arith.constant 0 : i32
    %8 = vector.broadcast %c0_i32_2 : i32 to vector<1x1xi32>
    %c-2147483648_i32 = arith.constant -2147483648 : i32
    %9 = vector.broadcast %c-2147483648_i32 : i32 to vector<1x1xi32>
    %10 = arith.ori %8, %9 : vector<1x1xi32>
    %c-2147483648_i32_3 = arith.constant -2147483648 : i32
    %11 = vector.broadcast %c-2147483648_i32_3 : i32 to vector<1x1xi32>
    %12 = arith.xori %10, %11 : vector<1x1xi32>
    %13 = vector.broadcast %12 : vector<1x1xi32> to vector<1x256xi32>
    %14 = arith.cmpi slt, %7, %13 : vector<1x256xi32>
    %15 = arith.extui %14 : vector<1x256xi1> to vector<1x256xi32>
    %cst = arith.constant dense<0> : vector<1xi32>
    %16 = vector.multi_reduction <add>, %15, %cst [1] : vector<1x256xi32> to vector<1xi32>
    %17 = vector.shape_cast %16 : vector<1xi32> to vector<1x1xi32>
    %c178_i32 = arith.constant 178 : i32
    %18 = vector.broadcast %c178_i32 : i32 to vector<1x1xi32>
    %19 = arith.cmpi sle, %17, %18 : vector<1x1xi32>
    %20 = arith.select %19, %10, %8 : vector<1x1xi1>, vector<1x1xi32>
    %c1073741824_i32 = arith.constant 1073741824 : i32
    %21 = vector.broadcast %c1073741824_i32 : i32 to vector<1x1xi32>
    %22 = arith.ori %20, %21 : vector<1x1xi32>
    %c-2147483648_i32_4 = arith.constant -2147483648 : i32
    %23 = vector.broadcast %c-2147483648_i32_4 : i32 to vector<1x1xi32>
    %24 = arith.xori %22, %23 : vector<1x1xi32>
    %25 = vector.broadcast %24 : vector<1x1xi32> to vector<1x256xi32>
    %26 = arith.cmpi slt, %7, %25 : vector<1x256xi32>
    %27 = arith.extui %26 : vector<1x256xi1> to vector<1x256xi32>
    %cst_5 = arith.constant dense<0> : vector<1xi32>
    %28 = vector.multi_reduction <add>, %27, %cst_5 [1] : vector<1x256xi32> to vector<1xi32>
    %29 = vector.shape_cast %28 : vector<1xi32> to vector<1x1xi32>
    %c178_i32_6 = arith.constant 178 : i32
    %30 = vector.broadcast %c178_i32_6 : i32 to vector<1x1xi32>
    %31 = arith.cmpi sle, %29, %30 : vector<1x1xi32>
    %32 = arith.select %31, %22, %20 : vector<1x1xi1>, vector<1x1xi32>
    %c536870912_i32 = arith.constant 536870912 : i32
    %33 = vector.broadcast %c536870912_i32 : i32 to vector<1x1xi32>
    %34 = arith.ori %32, %33 : vector<1x1xi32>
    %c-2147483648_i32_7 = arith.constant -2147483648 : i32
    %35 = vector.broadcast %c-2147483648_i32_7 : i32 to vector<1x1xi32>
    %36 = arith.xori %34, %35 : vector<1x1xi32>
    %37 = vector.broadcast %36 : vector<1x1xi32> to vector<1x256xi32>
    %38 = arith.cmpi slt, %7, %37 : vector<1x256xi32>
    %39 = arith.extui %38 : vector<1x256xi1> to vector<1x256xi32>
    %cst_8 = arith.constant dense<0> : vector<1xi32>
    %40 = vector.multi_reduction <add>, %39, %cst_8 [1] : vector<1x256xi32> to vector<1xi32>
    %41 = vector.shape_cast %40 : vector<1xi32> to vector<1x1xi32>
    %c178_i32_9 = arith.constant 178 : i32
    %42 = vector.broadcast %c178_i32_9 : i32 to vector<1x1xi32>
    %43 = arith.cmpi sle, %41, %42 : vector<1x1xi32>
    %44 = arith.select %43, %34, %32 : vector<1x1xi1>, vector<1x1xi32>
    %c268435456_i32 = arith.constant 268435456 : i32
    %45 = vector.broadcast %c268435456_i32 : i32 to vector<1x1xi32>
    %46 = arith.ori %44, %45 : vector<1x1xi32>
    %c-2147483648_i32_10 = arith.constant -2147483648 : i32
    %47 = vector.broadcast %c-2147483648_i32_10 : i32 to vector<1x1xi32>
    %48 = arith.xori %46, %47 : vector<1x1xi32>
    %49 = vector.broadcast %48 : vector<1x1xi32> to vector<1x256xi32>
    %50 = arith.cmpi slt, %7, %49 : vector<1x256xi32>
    %51 = arith.extui %50 : vector<1x256xi1> to vector<1x256xi32>
    %cst_11 = arith.constant dense<0> : vector<1xi32>
    %52 = vector.multi_reduction <add>, %51, %cst_11 [1] : vector<1x256xi32> to vector<1xi32>
    %53 = vector.shape_cast %52 : vector<1xi32> to vector<1x1xi32>
    %c178_i32_12 = arith.constant 178 : i32
    %54 = vector.broadcast %c178_i32_12 : i32 to vector<1x1xi32>
    %55 = arith.cmpi sle, %53, %54 : vector<1x1xi32>
    %56 = arith.select %55, %46, %44 : vector<1x1xi1>, vector<1x1xi32>
    %c134217728_i32 = arith.constant 134217728 : i32
    %57 = vector.broadcast %c134217728_i32 : i32 to vector<1x1xi32>
    %58 = arith.ori %56, %57 : vector<1x1xi32>
    %c-2147483648_i32_13 = arith.constant -2147483648 : i32
    %59 = vector.broadcast %c-2147483648_i32_13 : i32 to vector<1x1xi32>
    %60 = arith.xori %58, %59 : vector<1x1xi32>
    %61 = vector.broadcast %60 : vector<1x1xi32> to vector<1x256xi32>
    %62 = arith.cmpi slt, %7, %61 : vector<1x256xi32>
    %63 = arith.extui %62 : vector<1x256xi1> to vector<1x256xi32>
    %cst_14 = arith.constant dense<0> : vector<1xi32>
    %64 = vector.multi_reduction <add>, %63, %cst_14 [1] : vector<1x256xi32> to vector<1xi32>
    %65 = vector.shape_cast %64 : vector<1xi32> to vector<1x1xi32>
    %c178_i32_15 = arith.constant 178 : i32
    %66 = vector.broadcast %c178_i32_15 : i32 to vector<1x1xi32>
    %67 = arith.cmpi sle, %65, %66 : vector<1x1xi32>
    %68 = arith.select %67, %58, %56 : vector<1x1xi1>, vector<1x1xi32>
    %c67108864_i32 = arith.constant 67108864 : i32
    %69 = vector.broadcast %c67108864_i32 : i32 to vector<1x1xi32>
    %70 = arith.ori %68, %69 : vector<1x1xi32>
    %c-2147483648_i32_16 = arith.constant -2147483648 : i32
    %71 = vector.broadcast %c-2147483648_i32_16 : i32 to vector<1x1xi32>
    %72 = arith.xori %70, %71 : vector<1x1xi32>
    %73 = vector.broadcast %72 : vector<1x1xi32> to vector<1x256xi32>
    %74 = arith.cmpi slt, %7, %73 : vector<1x256xi32>
    %75 = arith.extui %74 : vector<1x256xi1> to vector<1x256xi32>
    %cst_17 = arith.constant dense<0> : vector<1xi32>
    %76 = vector.multi_reduction <add>, %75, %cst_17 [1] : vector<1x256xi32> to vector<1xi32>
    %77 = vector.shape_cast %76 : vector<1xi32> to vector<1x1xi32>
    %c178_i32_18 = arith.constant 178 : i32
    %78 = vector.broadcast %c178_i32_18 : i32 to vector<1x1xi32>
    %79 = arith.cmpi sle, %77, %78 : vector<1x1xi32>
    %80 = arith.select %79, %70, %68 : vector<1x1xi1>, vector<1x1xi32>
    %c33554432_i32 = arith.constant 33554432 : i32
    %81 = vector.broadcast %c33554432_i32 : i32 to vector<1x1xi32>
    %82 = arith.ori %80, %81 : vector<1x1xi32>
    %c-2147483648_i32_19 = arith.constant -2147483648 : i32
    %83 = vector.broadcast %c-2147483648_i32_19 : i32 to vector<1x1xi32>
    %84 = arith.xori %82, %83 : vector<1x1xi32>
    %85 = vector.broadcast %84 : vector<1x1xi32> to vector<1x256xi32>
    %86 = arith.cmpi slt, %7, %85 : vector<1x256xi32>
    %87 = arith.extui %86 : vector<1x256xi1> to vector<1x256xi32>
    %cst_20 = arith.constant dense<0> : vector<1xi32>
    %88 = vector.multi_reduction <add>, %87, %cst_20 [1] : vector<1x256xi32> to vector<1xi32>
    %89 = vector.shape_cast %88 : vector<1xi32> to vector<1x1xi32>
    %c178_i32_21 = arith.constant 178 : i32
    %90 = vector.broadcast %c178_i32_21 : i32 to vector<1x1xi32>
    %91 = arith.cmpi sle, %89, %90 : vector<1x1xi32>
    %92 = arith.select %91, %82, %80 : vector<1x1xi1>, vector<1x1xi32>
    %c16777216_i32 = arith.constant 16777216 : i32
    %93 = vector.broadcast %c16777216_i32 : i32 to vector<1x1xi32>
    %94 = arith.ori %92, %93 : vector<1x1xi32>
    %c-2147483648_i32_22 = arith.constant -2147483648 : i32
    %95 = vector.broadcast %c-2147483648_i32_22 : i32 to vector<1x1xi32>
    %96 = arith.xori %94, %95 : vector<1x1xi32>
    %97 = vector.broadcast %96 : vector<1x1xi32> to vector<1x256xi32>
    %98 = arith.cmpi slt, %7, %97 : vector<1x256xi32>
    %99 = arith.extui %98 : vector<1x256xi1> to vector<1x256xi32>
    %cst_23 = arith.constant dense<0> : vector<1xi32>
    %100 = vector.multi_reduction <add>, %99, %cst_23 [1] : vector<1x256xi32> to vector<1xi32>
    %101 = vector.shape_cast %100 : vector<1xi32> to vector<1x1xi32>
    %c178_i32_24 = arith.constant 178 : i32
    %102 = vector.broadcast %c178_i32_24 : i32 to vector<1x1xi32>
    %103 = arith.cmpi sle, %101, %102 : vector<1x1xi32>
    %104 = arith.select %103, %94, %92 : vector<1x1xi1>, vector<1x1xi32>
    %c8388608_i32 = arith.constant 8388608 : i32
    %105 = vector.broadcast %c8388608_i32 : i32 to vector<1x1xi32>
    %106 = arith.ori %104, %105 : vector<1x1xi32>
    %c-2147483648_i32_25 = arith.constant -2147483648 : i32
    %107 = vector.broadcast %c-2147483648_i32_25 : i32 to vector<1x1xi32>
    %108 = arith.xori %106, %107 : vector<1x1xi32>
    %109 = vector.broadcast %108 : vector<1x1xi32> to vector<1x256xi32>
    %110 = arith.cmpi slt, %7, %109 : vector<1x256xi32>
    %111 = arith.extui %110 : vector<1x256xi1> to vector<1x256xi32>
    %cst_26 = arith.constant dense<0> : vector<1xi32>
    %112 = vector.multi_reduction <add>, %111, %cst_26 [1] : vector<1x256xi32> to vector<1xi32>
    %113 = vector.shape_cast %112 : vector<1xi32> to vector<1x1xi32>
    %c178_i32_27 = arith.constant 178 : i32
    %114 = vector.broadcast %c178_i32_27 : i32 to vector<1x1xi32>
    %115 = arith.cmpi sle, %113, %114 : vector<1x1xi32>
    %116 = arith.select %115, %106, %104 : vector<1x1xi1>, vector<1x1xi32>
    %c4194304_i32 = arith.constant 4194304 : i32
    %117 = vector.broadcast %c4194304_i32 : i32 to vector<1x1xi32>
    %118 = arith.ori %116, %117 : vector<1x1xi32>
    %c-2147483648_i32_28 = arith.constant -2147483648 : i32
    %119 = vector.broadcast %c-2147483648_i32_28 : i32 to vector<1x1xi32>
    %120 = arith.xori %118, %119 : vector<1x1xi32>
    %121 = vector.broadcast %120 : vector<1x1xi32> to vector<1x256xi32>
    %122 = arith.cmpi slt, %7, %121 : vector<1x256xi32>
    %123 = arith.extui %122 : vector<1x256xi1> to vector<1x256xi32>
    %cst_29 = arith.constant dense<0> : vector<1xi32>
    %124 = vector.multi_reduction <add>, %123, %cst_29 [1] : vector<1x256xi32> to vector<1xi32>
    %125 = vector.shape_cast %124 : vector<1xi32> to vector<1x1xi32>
    %c178_i32_30 = arith.constant 178 : i32
    %126 = vector.broadcast %c178_i32_30 : i32 to vector<1x1xi32>
    %127 = arith.cmpi sle, %125, %126 : vector<1x1xi32>
    %128 = arith.select %127, %118, %116 : vector<1x1xi1>, vector<1x1xi32>
    %c2097152_i32 = arith.constant 2097152 : i32
    %129 = vector.broadcast %c2097152_i32 : i32 to vector<1x1xi32>
    %130 = arith.ori %128, %129 : vector<1x1xi32>
    %c-2147483648_i32_31 = arith.constant -2147483648 : i32
    %131 = vector.broadcast %c-2147483648_i32_31 : i32 to vector<1x1xi32>
    %132 = arith.xori %130, %131 : vector<1x1xi32>
    %133 = vector.broadcast %132 : vector<1x1xi32> to vector<1x256xi32>
    %134 = arith.cmpi slt, %7, %133 : vector<1x256xi32>
    %135 = arith.extui %134 : vector<1x256xi1> to vector<1x256xi32>
    %cst_32 = arith.constant dense<0> : vector<1xi32>
    %136 = vector.multi_reduction <add>, %135, %cst_32 [1] : vector<1x256xi32> to vector<1xi32>
    %137 = vector.shape_cast %136 : vector<1xi32> to vector<1x1xi32>
    %c178_i32_33 = arith.constant 178 : i32
    %138 = vector.broadcast %c178_i32_33 : i32 to vector<1x1xi32>
    %139 = arith.cmpi sle, %137, %138 : vector<1x1xi32>
    %140 = arith.select %139, %130, %128 : vector<1x1xi1>, vector<1x1xi32>
    %c1048576_i32 = arith.constant 1048576 : i32
    %141 = vector.broadcast %c1048576_i32 : i32 to vector<1x1xi32>
    %142 = arith.ori %140, %141 : vector<1x1xi32>
    %c-2147483648_i32_34 = arith.constant -2147483648 : i32
    %143 = vector.broadcast %c-2147483648_i32_34 : i32 to vector<1x1xi32>
    %144 = arith.xori %142, %143 : vector<1x1xi32>
    %145 = vector.broadcast %144 : vector<1x1xi32> to vector<1x256xi32>
    %146 = arith.cmpi slt, %7, %145 : vector<1x256xi32>
    %147 = arith.extui %146 : vector<1x256xi1> to vector<1x256xi32>
    %cst_35 = arith.constant dense<0> : vector<1xi32>
    %148 = vector.multi_reduction <add>, %147, %cst_35 [1] : vector<1x256xi32> to vector<1xi32>
    %149 = vector.shape_cast %148 : vector<1xi32> to vector<1x1xi32>
    %c178_i32_36 = arith.constant 178 : i32
    %150 = vector.broadcast %c178_i32_36 : i32 to vector<1x1xi32>
    %151 = arith.cmpi sle, %149, %150 : vector<1x1xi32>
    %152 = arith.select %151, %142, %140 : vector<1x1xi1>, vector<1x1xi32>
    %c524288_i32 = arith.constant 524288 : i32
    %153 = vector.broadcast %c524288_i32 : i32 to vector<1x1xi32>
    %154 = arith.ori %152, %153 : vector<1x1xi32>
    %c-2147483648_i32_37 = arith.constant -2147483648 : i32
    %155 = vector.broadcast %c-2147483648_i32_37 : i32 to vector<1x1xi32>
    %156 = arith.xori %154, %155 : vector<1x1xi32>
    %157 = vector.broadcast %156 : vector<1x1xi32> to vector<1x256xi32>
    %158 = arith.cmpi slt, %7, %157 : vector<1x256xi32>
    %159 = arith.extui %158 : vector<1x256xi1> to vector<1x256xi32>
    %cst_38 = arith.constant dense<0> : vector<1xi32>
    %160 = vector.multi_reduction <add>, %159, %cst_38 [1] : vector<1x256xi32> to vector<1xi32>
    %161 = vector.shape_cast %160 : vector<1xi32> to vector<1x1xi32>
    %c178_i32_39 = arith.constant 178 : i32
    %162 = vector.broadcast %c178_i32_39 : i32 to vector<1x1xi32>
    %163 = arith.cmpi sle, %161, %162 : vector<1x1xi32>
    %164 = arith.select %163, %154, %152 : vector<1x1xi1>, vector<1x1xi32>
    %c262144_i32 = arith.constant 262144 : i32
    %165 = vector.broadcast %c262144_i32 : i32 to vector<1x1xi32>
    %166 = arith.ori %164, %165 : vector<1x1xi32>
    %c-2147483648_i32_40 = arith.constant -2147483648 : i32
    %167 = vector.broadcast %c-2147483648_i32_40 : i32 to vector<1x1xi32>
    %168 = arith.xori %166, %167 : vector<1x1xi32>
    %169 = vector.broadcast %168 : vector<1x1xi32> to vector<1x256xi32>
    %170 = arith.cmpi slt, %7, %169 : vector<1x256xi32>
    %171 = arith.extui %170 : vector<1x256xi1> to vector<1x256xi32>
    %cst_41 = arith.constant dense<0> : vector<1xi32>
    %172 = vector.multi_reduction <add>, %171, %cst_41 [1] : vector<1x256xi32> to vector<1xi32>
    %173 = vector.shape_cast %172 : vector<1xi32> to vector<1x1xi32>
    %c178_i32_42 = arith.constant 178 : i32
    %174 = vector.broadcast %c178_i32_42 : i32 to vector<1x1xi32>
    %175 = arith.cmpi sle, %173, %174 : vector<1x1xi32>
    %176 = arith.select %175, %166, %164 : vector<1x1xi1>, vector<1x1xi32>
    %c131072_i32 = arith.constant 131072 : i32
    %177 = vector.broadcast %c131072_i32 : i32 to vector<1x1xi32>
    %178 = arith.ori %176, %177 : vector<1x1xi32>
    %c-2147483648_i32_43 = arith.constant -2147483648 : i32
    %179 = vector.broadcast %c-2147483648_i32_43 : i32 to vector<1x1xi32>
    %180 = arith.xori %178, %179 : vector<1x1xi32>
    %181 = vector.broadcast %180 : vector<1x1xi32> to vector<1x256xi32>
    %182 = arith.cmpi slt, %7, %181 : vector<1x256xi32>
    %183 = arith.extui %182 : vector<1x256xi1> to vector<1x256xi32>
    %cst_44 = arith.constant dense<0> : vector<1xi32>
    %184 = vector.multi_reduction <add>, %183, %cst_44 [1] : vector<1x256xi32> to vector<1xi32>
    %185 = vector.shape_cast %184 : vector<1xi32> to vector<1x1xi32>
    %c178_i32_45 = arith.constant 178 : i32
    %186 = vector.broadcast %c178_i32_45 : i32 to vector<1x1xi32>
    %187 = arith.cmpi sle, %185, %186 : vector<1x1xi32>
    %188 = arith.select %187, %178, %176 : vector<1x1xi1>, vector<1x1xi32>
    %c65536_i32 = arith.constant 65536 : i32
    %189 = vector.broadcast %c65536_i32 : i32 to vector<1x1xi32>
    %190 = arith.ori %188, %189 : vector<1x1xi32>
    %c-2147483648_i32_46 = arith.constant -2147483648 : i32
    %191 = vector.broadcast %c-2147483648_i32_46 : i32 to vector<1x1xi32>
    %192 = arith.xori %190, %191 : vector<1x1xi32>
    %193 = vector.broadcast %192 : vector<1x1xi32> to vector<1x256xi32>
    %194 = arith.cmpi slt, %7, %193 : vector<1x256xi32>
    %195 = arith.extui %194 : vector<1x256xi1> to vector<1x256xi32>
    %cst_47 = arith.constant dense<0> : vector<1xi32>
    %196 = vector.multi_reduction <add>, %195, %cst_47 [1] : vector<1x256xi32> to vector<1xi32>
    %197 = vector.shape_cast %196 : vector<1xi32> to vector<1x1xi32>
    %c178_i32_48 = arith.constant 178 : i32
    %198 = vector.broadcast %c178_i32_48 : i32 to vector<1x1xi32>
    %199 = arith.cmpi sle, %197, %198 : vector<1x1xi32>
    %200 = arith.select %199, %190, %188 : vector<1x1xi1>, vector<1x1xi32>
    %c32768_i32 = arith.constant 32768 : i32
    %201 = vector.broadcast %c32768_i32 : i32 to vector<1x1xi32>
    %202 = arith.ori %200, %201 : vector<1x1xi32>
    %c-2147483648_i32_49 = arith.constant -2147483648 : i32
    %203 = vector.broadcast %c-2147483648_i32_49 : i32 to vector<1x1xi32>
    %204 = arith.xori %202, %203 : vector<1x1xi32>
    %205 = vector.broadcast %204 : vector<1x1xi32> to vector<1x256xi32>
    %206 = arith.cmpi slt, %7, %205 : vector<1x256xi32>
    %207 = arith.extui %206 : vector<1x256xi1> to vector<1x256xi32>
    %cst_50 = arith.constant dense<0> : vector<1xi32>
    %208 = vector.multi_reduction <add>, %207, %cst_50 [1] : vector<1x256xi32> to vector<1xi32>
    %209 = vector.shape_cast %208 : vector<1xi32> to vector<1x1xi32>
    %c178_i32_51 = arith.constant 178 : i32
    %210 = vector.broadcast %c178_i32_51 : i32 to vector<1x1xi32>
    %211 = arith.cmpi sle, %209, %210 : vector<1x1xi32>
    %212 = arith.select %211, %202, %200 : vector<1x1xi1>, vector<1x1xi32>
    %c16384_i32 = arith.constant 16384 : i32
    %213 = vector.broadcast %c16384_i32 : i32 to vector<1x1xi32>
    %214 = arith.ori %212, %213 : vector<1x1xi32>
    %c-2147483648_i32_52 = arith.constant -2147483648 : i32
    %215 = vector.broadcast %c-2147483648_i32_52 : i32 to vector<1x1xi32>
    %216 = arith.xori %214, %215 : vector<1x1xi32>
    %217 = vector.broadcast %216 : vector<1x1xi32> to vector<1x256xi32>
    %218 = arith.cmpi slt, %7, %217 : vector<1x256xi32>
    %219 = arith.extui %218 : vector<1x256xi1> to vector<1x256xi32>
    %cst_53 = arith.constant dense<0> : vector<1xi32>
    %220 = vector.multi_reduction <add>, %219, %cst_53 [1] : vector<1x256xi32> to vector<1xi32>
    %221 = vector.shape_cast %220 : vector<1xi32> to vector<1x1xi32>
    %c178_i32_54 = arith.constant 178 : i32
    %222 = vector.broadcast %c178_i32_54 : i32 to vector<1x1xi32>
    %223 = arith.cmpi sle, %221, %222 : vector<1x1xi32>
    %224 = arith.select %223, %214, %212 : vector<1x1xi1>, vector<1x1xi32>
    %c8192_i32 = arith.constant 8192 : i32
    %225 = vector.broadcast %c8192_i32 : i32 to vector<1x1xi32>
    %226 = arith.ori %224, %225 : vector<1x1xi32>
    %c-2147483648_i32_55 = arith.constant -2147483648 : i32
    %227 = vector.broadcast %c-2147483648_i32_55 : i32 to vector<1x1xi32>
    %228 = arith.xori %226, %227 : vector<1x1xi32>
    %229 = vector.broadcast %228 : vector<1x1xi32> to vector<1x256xi32>
    %230 = arith.cmpi slt, %7, %229 : vector<1x256xi32>
    %231 = arith.extui %230 : vector<1x256xi1> to vector<1x256xi32>
    %cst_56 = arith.constant dense<0> : vector<1xi32>
    %232 = vector.multi_reduction <add>, %231, %cst_56 [1] : vector<1x256xi32> to vector<1xi32>
    %233 = vector.shape_cast %232 : vector<1xi32> to vector<1x1xi32>
    %c178_i32_57 = arith.constant 178 : i32
    %234 = vector.broadcast %c178_i32_57 : i32 to vector<1x1xi32>
    %235 = arith.cmpi sle, %233, %234 : vector<1x1xi32>
    %236 = arith.select %235, %226, %224 : vector<1x1xi1>, vector<1x1xi32>
    %c4096_i32 = arith.constant 4096 : i32
    %237 = vector.broadcast %c4096_i32 : i32 to vector<1x1xi32>
    %238 = arith.ori %236, %237 : vector<1x1xi32>
    %c-2147483648_i32_58 = arith.constant -2147483648 : i32
    %239 = vector.broadcast %c-2147483648_i32_58 : i32 to vector<1x1xi32>
    %240 = arith.xori %238, %239 : vector<1x1xi32>
    %241 = vector.broadcast %240 : vector<1x1xi32> to vector<1x256xi32>
    %242 = arith.cmpi slt, %7, %241 : vector<1x256xi32>
    %243 = arith.extui %242 : vector<1x256xi1> to vector<1x256xi32>
    %cst_59 = arith.constant dense<0> : vector<1xi32>
    %244 = vector.multi_reduction <add>, %243, %cst_59 [1] : vector<1x256xi32> to vector<1xi32>
    %245 = vector.shape_cast %244 : vector<1xi32> to vector<1x1xi32>
    %c178_i32_60 = arith.constant 178 : i32
    %246 = vector.broadcast %c178_i32_60 : i32 to vector<1x1xi32>
    %247 = arith.cmpi sle, %245, %246 : vector<1x1xi32>
    %248 = arith.select %247, %238, %236 : vector<1x1xi1>, vector<1x1xi32>
    %c2048_i32 = arith.constant 2048 : i32
    %249 = vector.broadcast %c2048_i32 : i32 to vector<1x1xi32>
    %250 = arith.ori %248, %249 : vector<1x1xi32>
    %c-2147483648_i32_61 = arith.constant -2147483648 : i32
    %251 = vector.broadcast %c-2147483648_i32_61 : i32 to vector<1x1xi32>
    %252 = arith.xori %250, %251 : vector<1x1xi32>
    %253 = vector.broadcast %252 : vector<1x1xi32> to vector<1x256xi32>
    %254 = arith.cmpi slt, %7, %253 : vector<1x256xi32>
    %255 = arith.extui %254 : vector<1x256xi1> to vector<1x256xi32>
    %cst_62 = arith.constant dense<0> : vector<1xi32>
    %256 = vector.multi_reduction <add>, %255, %cst_62 [1] : vector<1x256xi32> to vector<1xi32>
    %257 = vector.shape_cast %256 : vector<1xi32> to vector<1x1xi32>
    %c178_i32_63 = arith.constant 178 : i32
    %258 = vector.broadcast %c178_i32_63 : i32 to vector<1x1xi32>
    %259 = arith.cmpi sle, %257, %258 : vector<1x1xi32>
    %260 = arith.select %259, %250, %248 : vector<1x1xi1>, vector<1x1xi32>
    %c1024_i32 = arith.constant 1024 : i32
    %261 = vector.broadcast %c1024_i32 : i32 to vector<1x1xi32>
    %262 = arith.ori %260, %261 : vector<1x1xi32>
    %c-2147483648_i32_64 = arith.constant -2147483648 : i32
    %263 = vector.broadcast %c-2147483648_i32_64 : i32 to vector<1x1xi32>
    %264 = arith.xori %262, %263 : vector<1x1xi32>
    %265 = vector.broadcast %264 : vector<1x1xi32> to vector<1x256xi32>
    %266 = arith.cmpi slt, %7, %265 : vector<1x256xi32>
    %267 = arith.extui %266 : vector<1x256xi1> to vector<1x256xi32>
    %cst_65 = arith.constant dense<0> : vector<1xi32>
    %268 = vector.multi_reduction <add>, %267, %cst_65 [1] : vector<1x256xi32> to vector<1xi32>
    %269 = vector.shape_cast %268 : vector<1xi32> to vector<1x1xi32>
    %c178_i32_66 = arith.constant 178 : i32
    %270 = vector.broadcast %c178_i32_66 : i32 to vector<1x1xi32>
    %271 = arith.cmpi sle, %269, %270 : vector<1x1xi32>
    %272 = arith.select %271, %262, %260 : vector<1x1xi1>, vector<1x1xi32>
    %c512_i32 = arith.constant 512 : i32
    %273 = vector.broadcast %c512_i32 : i32 to vector<1x1xi32>
    %274 = arith.ori %272, %273 : vector<1x1xi32>
    %c-2147483648_i32_67 = arith.constant -2147483648 : i32
    %275 = vector.broadcast %c-2147483648_i32_67 : i32 to vector<1x1xi32>
    %276 = arith.xori %274, %275 : vector<1x1xi32>
    %277 = vector.broadcast %276 : vector<1x1xi32> to vector<1x256xi32>
    %278 = arith.cmpi slt, %7, %277 : vector<1x256xi32>
    %279 = arith.extui %278 : vector<1x256xi1> to vector<1x256xi32>
    %cst_68 = arith.constant dense<0> : vector<1xi32>
    %280 = vector.multi_reduction <add>, %279, %cst_68 [1] : vector<1x256xi32> to vector<1xi32>
    %281 = vector.shape_cast %280 : vector<1xi32> to vector<1x1xi32>
    %c178_i32_69 = arith.constant 178 : i32
    %282 = vector.broadcast %c178_i32_69 : i32 to vector<1x1xi32>
    %283 = arith.cmpi sle, %281, %282 : vector<1x1xi32>
    %284 = arith.select %283, %274, %272 : vector<1x1xi1>, vector<1x1xi32>
    %c256_i32 = arith.constant 256 : i32
    %285 = vector.broadcast %c256_i32 : i32 to vector<1x1xi32>
    %286 = arith.ori %284, %285 : vector<1x1xi32>
    %c-2147483648_i32_70 = arith.constant -2147483648 : i32
    %287 = vector.broadcast %c-2147483648_i32_70 : i32 to vector<1x1xi32>
    %288 = arith.xori %286, %287 : vector<1x1xi32>
    %289 = vector.broadcast %288 : vector<1x1xi32> to vector<1x256xi32>
    %290 = arith.cmpi slt, %7, %289 : vector<1x256xi32>
    %291 = arith.extui %290 : vector<1x256xi1> to vector<1x256xi32>
    %cst_71 = arith.constant dense<0> : vector<1xi32>
    %292 = vector.multi_reduction <add>, %291, %cst_71 [1] : vector<1x256xi32> to vector<1xi32>
    %293 = vector.shape_cast %292 : vector<1xi32> to vector<1x1xi32>
    %c178_i32_72 = arith.constant 178 : i32
    %294 = vector.broadcast %c178_i32_72 : i32 to vector<1x1xi32>
    %295 = arith.cmpi sle, %293, %294 : vector<1x1xi32>
    %296 = arith.select %295, %286, %284 : vector<1x1xi1>, vector<1x1xi32>
    %c128_i32 = arith.constant 128 : i32
    %297 = vector.broadcast %c128_i32 : i32 to vector<1x1xi32>
    %298 = arith.ori %296, %297 : vector<1x1xi32>
    %c-2147483648_i32_73 = arith.constant -2147483648 : i32
    %299 = vector.broadcast %c-2147483648_i32_73 : i32 to vector<1x1xi32>
    %300 = arith.xori %298, %299 : vector<1x1xi32>
    %301 = vector.broadcast %300 : vector<1x1xi32> to vector<1x256xi32>
    %302 = arith.cmpi slt, %7, %301 : vector<1x256xi32>
    %303 = arith.extui %302 : vector<1x256xi1> to vector<1x256xi32>
    %cst_74 = arith.constant dense<0> : vector<1xi32>
    %304 = vector.multi_reduction <add>, %303, %cst_74 [1] : vector<1x256xi32> to vector<1xi32>
    %305 = vector.shape_cast %304 : vector<1xi32> to vector<1x1xi32>
    %c178_i32_75 = arith.constant 178 : i32
    %306 = vector.broadcast %c178_i32_75 : i32 to vector<1x1xi32>
    %307 = arith.cmpi sle, %305, %306 : vector<1x1xi32>
    %308 = arith.select %307, %298, %296 : vector<1x1xi1>, vector<1x1xi32>
    %c64_i32 = arith.constant 64 : i32
    %309 = vector.broadcast %c64_i32 : i32 to vector<1x1xi32>
    %310 = arith.ori %308, %309 : vector<1x1xi32>
    %c-2147483648_i32_76 = arith.constant -2147483648 : i32
    %311 = vector.broadcast %c-2147483648_i32_76 : i32 to vector<1x1xi32>
    %312 = arith.xori %310, %311 : vector<1x1xi32>
    %313 = vector.broadcast %312 : vector<1x1xi32> to vector<1x256xi32>
    %314 = arith.cmpi slt, %7, %313 : vector<1x256xi32>
    %315 = arith.extui %314 : vector<1x256xi1> to vector<1x256xi32>
    %cst_77 = arith.constant dense<0> : vector<1xi32>
    %316 = vector.multi_reduction <add>, %315, %cst_77 [1] : vector<1x256xi32> to vector<1xi32>
    %317 = vector.shape_cast %316 : vector<1xi32> to vector<1x1xi32>
    %c178_i32_78 = arith.constant 178 : i32
    %318 = vector.broadcast %c178_i32_78 : i32 to vector<1x1xi32>
    %319 = arith.cmpi sle, %317, %318 : vector<1x1xi32>
    %320 = arith.select %319, %310, %308 : vector<1x1xi1>, vector<1x1xi32>
    %c32_i32 = arith.constant 32 : i32
    %321 = vector.broadcast %c32_i32 : i32 to vector<1x1xi32>
    %322 = arith.ori %320, %321 : vector<1x1xi32>
    %c-2147483648_i32_79 = arith.constant -2147483648 : i32
    %323 = vector.broadcast %c-2147483648_i32_79 : i32 to vector<1x1xi32>
    %324 = arith.xori %322, %323 : vector<1x1xi32>
    %325 = vector.broadcast %324 : vector<1x1xi32> to vector<1x256xi32>
    %326 = arith.cmpi slt, %7, %325 : vector<1x256xi32>
    %327 = arith.extui %326 : vector<1x256xi1> to vector<1x256xi32>
    %cst_80 = arith.constant dense<0> : vector<1xi32>
    %328 = vector.multi_reduction <add>, %327, %cst_80 [1] : vector<1x256xi32> to vector<1xi32>
    %329 = vector.shape_cast %328 : vector<1xi32> to vector<1x1xi32>
    %c178_i32_81 = arith.constant 178 : i32
    %330 = vector.broadcast %c178_i32_81 : i32 to vector<1x1xi32>
    %331 = arith.cmpi sle, %329, %330 : vector<1x1xi32>
    %332 = arith.select %331, %322, %320 : vector<1x1xi1>, vector<1x1xi32>
    %c16_i32 = arith.constant 16 : i32
    %333 = vector.broadcast %c16_i32 : i32 to vector<1x1xi32>
    %334 = arith.ori %332, %333 : vector<1x1xi32>
    %c-2147483648_i32_82 = arith.constant -2147483648 : i32
    %335 = vector.broadcast %c-2147483648_i32_82 : i32 to vector<1x1xi32>
    %336 = arith.xori %334, %335 : vector<1x1xi32>
    %337 = vector.broadcast %336 : vector<1x1xi32> to vector<1x256xi32>
    %338 = arith.cmpi slt, %7, %337 : vector<1x256xi32>
    %339 = arith.extui %338 : vector<1x256xi1> to vector<1x256xi32>
    %cst_83 = arith.constant dense<0> : vector<1xi32>
    %340 = vector.multi_reduction <add>, %339, %cst_83 [1] : vector<1x256xi32> to vector<1xi32>
    %341 = vector.shape_cast %340 : vector<1xi32> to vector<1x1xi32>
    %c178_i32_84 = arith.constant 178 : i32
    %342 = vector.broadcast %c178_i32_84 : i32 to vector<1x1xi32>
    %343 = arith.cmpi sle, %341, %342 : vector<1x1xi32>
    %344 = arith.select %343, %334, %332 : vector<1x1xi1>, vector<1x1xi32>
    %c8_i32 = arith.constant 8 : i32
    %345 = vector.broadcast %c8_i32 : i32 to vector<1x1xi32>
    %346 = arith.ori %344, %345 : vector<1x1xi32>
    %c-2147483648_i32_85 = arith.constant -2147483648 : i32
    %347 = vector.broadcast %c-2147483648_i32_85 : i32 to vector<1x1xi32>
    %348 = arith.xori %346, %347 : vector<1x1xi32>
    %349 = vector.broadcast %348 : vector<1x1xi32> to vector<1x256xi32>
    %350 = arith.cmpi slt, %7, %349 : vector<1x256xi32>
    %351 = arith.extui %350 : vector<1x256xi1> to vector<1x256xi32>
    %cst_86 = arith.constant dense<0> : vector<1xi32>
    %352 = vector.multi_reduction <add>, %351, %cst_86 [1] : vector<1x256xi32> to vector<1xi32>
    %353 = vector.shape_cast %352 : vector<1xi32> to vector<1x1xi32>
    %c178_i32_87 = arith.constant 178 : i32
    %354 = vector.broadcast %c178_i32_87 : i32 to vector<1x1xi32>
    %355 = arith.cmpi sle, %353, %354 : vector<1x1xi32>
    %356 = arith.select %355, %346, %344 : vector<1x1xi1>, vector<1x1xi32>
    %c4_i32 = arith.constant 4 : i32
    %357 = vector.broadcast %c4_i32 : i32 to vector<1x1xi32>
    %358 = arith.ori %356, %357 : vector<1x1xi32>
    %c-2147483648_i32_88 = arith.constant -2147483648 : i32
    %359 = vector.broadcast %c-2147483648_i32_88 : i32 to vector<1x1xi32>
    %360 = arith.xori %358, %359 : vector<1x1xi32>
    %361 = vector.broadcast %360 : vector<1x1xi32> to vector<1x256xi32>
    %362 = arith.cmpi slt, %7, %361 : vector<1x256xi32>
    %363 = arith.extui %362 : vector<1x256xi1> to vector<1x256xi32>
    %cst_89 = arith.constant dense<0> : vector<1xi32>
    %364 = vector.multi_reduction <add>, %363, %cst_89 [1] : vector<1x256xi32> to vector<1xi32>
    %365 = vector.shape_cast %364 : vector<1xi32> to vector<1x1xi32>
    %c178_i32_90 = arith.constant 178 : i32
    %366 = vector.broadcast %c178_i32_90 : i32 to vector<1x1xi32>
    %367 = arith.cmpi sle, %365, %366 : vector<1x1xi32>
    %368 = arith.select %367, %358, %356 : vector<1x1xi1>, vector<1x1xi32>
    %c2_i32 = arith.constant 2 : i32
    %369 = vector.broadcast %c2_i32 : i32 to vector<1x1xi32>
    %370 = arith.ori %368, %369 : vector<1x1xi32>
    %c-2147483648_i32_91 = arith.constant -2147483648 : i32
    %371 = vector.broadcast %c-2147483648_i32_91 : i32 to vector<1x1xi32>
    %372 = arith.xori %370, %371 : vector<1x1xi32>
    %373 = vector.broadcast %372 : vector<1x1xi32> to vector<1x256xi32>
    %374 = arith.cmpi slt, %7, %373 : vector<1x256xi32>
    %375 = arith.extui %374 : vector<1x256xi1> to vector<1x256xi32>
    %cst_92 = arith.constant dense<0> : vector<1xi32>
    %376 = vector.multi_reduction <add>, %375, %cst_92 [1] : vector<1x256xi32> to vector<1xi32>
    %377 = vector.shape_cast %376 : vector<1xi32> to vector<1x1xi32>
    %c178_i32_93 = arith.constant 178 : i32
    %378 = vector.broadcast %c178_i32_93 : i32 to vector<1x1xi32>
    %379 = arith.cmpi sle, %377, %378 : vector<1x1xi32>
    %380 = arith.select %379, %370, %368 : vector<1x1xi1>, vector<1x1xi32>
    %c1_i32 = arith.constant 1 : i32
    %381 = vector.broadcast %c1_i32 : i32 to vector<1x1xi32>
    %382 = arith.ori %380, %381 : vector<1x1xi32>
    %c-2147483648_i32_94 = arith.constant -2147483648 : i32
    %383 = vector.broadcast %c-2147483648_i32_94 : i32 to vector<1x1xi32>
    %384 = arith.xori %382, %383 : vector<1x1xi32>
    %385 = vector.broadcast %384 : vector<1x1xi32> to vector<1x256xi32>
    %386 = arith.cmpi slt, %7, %385 : vector<1x256xi32>
    %387 = arith.extui %386 : vector<1x256xi1> to vector<1x256xi32>
    %cst_95 = arith.constant dense<0> : vector<1xi32>
    %388 = vector.multi_reduction <add>, %387, %cst_95 [1] : vector<1x256xi32> to vector<1xi32>
    %389 = vector.shape_cast %388 : vector<1xi32> to vector<1x1xi32>
    %c178_i32_96 = arith.constant 178 : i32
    %390 = vector.broadcast %c178_i32_96 : i32 to vector<1x1xi32>
    %391 = arith.cmpi sle, %389, %390 : vector<1x1xi32>
    %392 = arith.select %391, %382, %380 : vector<1x1xi1>, vector<1x1xi32>
    %c-2147483648_i32_97 = arith.constant -2147483648 : i32
    %393 = vector.broadcast %c-2147483648_i32_97 : i32 to vector<1x1xi32>
    %394 = arith.xori %392, %393 : vector<1x1xi32>
    %c0_i32_98 = arith.constant 0 : i32
    %395 = vector.broadcast %c0_i32_98 : i32 to vector<1x1xi32>
    %396 = arith.cmpi slt, %394, %395 : vector<1x1xi32>
    %c2147483647_i32_99 = arith.constant 2147483647 : i32
    %397 = vector.broadcast %c2147483647_i32_99 : i32 to vector<1x1xi32>
    %398 = arith.xori %394, %397 : vector<1x1xi32>
    %399 = arith.select %396, %398, %394 : vector<1x1xi1>, vector<1x1xi32>
    %400 = tpu.bitcast %399 : vector<1x1xi32> -> vector<1x1xf32>
    %401 = vector.broadcast %394 : vector<1x1xi32> to vector<1x256xi32>
    %402 = arith.cmpi sle, %7, %401 : vector<1x256xi32>
    %403 = arith.extui %402 : vector<1x256xi1> to vector<1x256xi32>
    %cst_100 = arith.constant dense<0> : vector<1xi32>
    %404 = vector.multi_reduction <add>, %403, %cst_100 [1] : vector<1x256xi32> to vector<1xi32>
    %405 = vector.shape_cast %404 : vector<1xi32> to vector<1x1xi32>
    %406 = vector.broadcast %394 : vector<1x1xi32> to vector<1x256xi32>
    %407 = arith.cmpi sgt, %7, %406 : vector<1x256xi32>
    %c2147483647_i32_101 = arith.constant 2147483647 : i32
    %408 = vector.broadcast %c2147483647_i32_101 : i32 to vector<1x256xi32>
    %409 = arith.select %407, %7, %408 : vector<1x256xi1>, vector<1x256xi32>
    %cst_102 = arith.constant dense<2147483647> : vector<1xi32>
    %410 = vector.multi_reduction <minsi>, %409, %cst_102 [1] : vector<1x256xi32> to vector<1xi32>
    %411 = vector.shape_cast %410 : vector<1xi32> to vector<1x1xi32>
    %c180_i32 = arith.constant 180 : i32
    %412 = vector.broadcast %c180_i32 : i32 to vector<1x1xi32>
    %413 = arith.cmpi sge, %405, %412 : vector<1x1xi32>
    %414 = arith.select %413, %394, %411 : vector<1x1xi1>, vector<1x1xi32>
    %c0_i32_103 = arith.constant 0 : i32
    %415 = vector.broadcast %c0_i32_103 : i32 to vector<1x1xi32>
    %416 = arith.cmpi slt, %414, %415 : vector<1x1xi32>
    %c2147483647_i32_104 = arith.constant 2147483647 : i32
    %417 = vector.broadcast %c2147483647_i32_104 : i32 to vector<1x1xi32>
    %418 = arith.xori %414, %417 : vector<1x1xi32>
    %419 = arith.select %416, %418, %414 : vector<1x1xi1>, vector<1x1xi32>
    %420 = tpu.bitcast %419 : vector<1x1xi32> -> vector<1x1xf32>
    %421 = arith.subf %420, %400 : vector<1x1xf32>
    %cst_105 = arith.constant 5.000000e-01 : f32
    %422 = vector.broadcast %cst_105 : f32 to vector<1x1xf32>
    %423 = arith.mulf %422, %421 : vector<1x1xf32>
    %424 = arith.addf %400, %423 : vector<1x1xf32>
    %425 = vector.shape_cast %424 : vector<1x1xf32> to vector<1x1x1xf32>
    %c0_106 = arith.constant 0 : index
    %c0_107 = arith.constant 0 : index
    %c0_108 = arith.constant 0 : index
    %426 = vector.load %arg2[%c0_106, %c0_107, %c0_108] : memref<1x1x1xf32, #tpu.memory_space<vmem>>, vector<1x1x1xf32>
    tpu.vector_store %arg2[%c0_106, %c0_107, %c0_108], %425 {strides = array<i32>} : memref<1x1x1xf32, #tpu.memory_space<vmem>>, vector<1x1x1xf32>,
    return
  }
  func.func @transform_0(%arg0: i32) -> (i32, i32, i32) {
    %c0_i32 = arith.constant 0 : i32
    %c0_i32_0 = arith.constant 0 : i32
    %c0_i32_1 = arith.constant 0 : i32
    return %arg0, %c0_i32, %c0_i32_0 : i32, i32, i32
  }
  func.func @transform_1(%arg0: i32) -> (i32, i32, i32) {
    %c0_i32 = arith.constant 0 : i32
    %c0_i32_0 = arith.constant 0 : i32
    %c0_i32_1 = arith.constant 0 : i32
    return %arg0, %c0_i32, %c0_i32_0 : i32, i32, i32
  }
}

</mosaic_0001>

<bundles_post_ra>
// kernel: _threshold_pallas.1
= control target key start
LH: loop header
LB: loop body
LE: loop exit
PB: predicated region body
PF: predicated region fallthrough
CT: control target
= control target key end

     0   :  { %6 = vsyncpa [#allocation3], 0  ;;  %s1434_s0 = inlined_call_operand.hbm [shape: f32[2,1,256], index: 0, kind: input, shape index: {}]   ;;  %s1435_s1 = inlined_call_operand.vmem [shape: f32[2,1,1], index: 1, kind: output, shape index: {}]  }
   0x1   :  { %8 = vsyncpa [#allocation3 + $0x1], 0  ;;  %s1125_s6 = smov 0   ;;  %s1127_s7 = smov 0  }
   0x2   :  { %s1129_s8 = smov 0   ;;  %s1131_s9 = smov 0  }
   0x3 LB: > { %s1144_s10 = sadd.s32 4294967295, %s1111_s9   ;;  %s1147_s11 = sadd.s32 1, %s1111_s9   ;;  %s1111_s9 = sphi %s1131_s9, %s1445_s9   ;;  %s1107_s8 = sphi %s1129_s8, %s1444_s8   ;;  %s1103_s7 = sphi %s1127_s7, %s1443_s7   ;;  %s1099_s6 = sphi %s1125_s6, %s1442_s6  }
   0x4   : > { %s18_s12 = ssub.s32 %s1111_s9, %s1147_s11  ;;  %s21_s13 = sadd.s32 1, %s1107_s8 }
   0x5   : > { %p19_p0 = scmp.eq.s32.totalorder %s18_s12, 0  ;;  %p28_p1 = scmp.ne.s32.totalorder %s1107_s8, %s1103_s7 }
   0x6   : > { %p29_p2 = scmp.eq.s32.totalorder %s1111_s9, 0  ;;  %p34_p3 = scmp.ne.s32.totalorder %s1103_s7, %s1099_s6 }
   0x7   : > { %s1157_s14 = scalar_select %p19_p0, %s1107_s8, %s21_s13  }
   0x8   : > { %p30_p4 = por %p29_p2, %p28_p1  ;;  %p35_p5 = scmp.eq.s32.totalorder %s1144_s10, 0 }
   0x9   : > { %p1015_p6 = scmp.lt.s32.totalorder %s1111_s9, 2  ;;  %s84_s16 = sand.u32 1, %s1107_s8  }
   0xa   : > { %p1161_p7 = por %p35_p5, %p34_p3  ;;  %s1001_s17 = sshll.u32 %s84_s16, 1 }
   0xb   : > { %s1008_s18 = sshll.u32 %s1111_s9, 5  ;;  %s88_s22 = scalar_lea.vmem [#allocation2], %s1001_s17 }
   0xc   : > { %s1437_s15 = scalar_select %p1161_p7, 1, 0 }
   0xd   : > { %s1170_s21 = scalar_lea.hbm %s1434_s0, %s1008_s18  ;;  %s96_s23 = sshll.u32 %s88_s22, 4  ;;  %s1172_s23 = int_to_ptr.vmem [resolvable:$true] %s96_s23 }
   0xe   : > { %p1174_p8 = pnand %p1015_p6, %p30_p4  ;;  %s85_s25 = scalar_lea.sflag [#allocation3], %s84_s16 }
   0xf   : > { %s1049_s26 = scalar_lea.hbm %s1170_s21, 32  ;;  %s1054_s29 = scalar_lea.hbm %s1434_s0, 64 }
  0x10   : > { %p1050_p11 = scmp.ne.s32.totalorder %s1170_s21, %s1049_s26  ;;  %p1051_p12 = pneg %p1174_p8 }
  0x11   : > { %p1055_p1 = scmp.lt.s32.totalorder %s1170_s21, %s1434_s0  ;;  %p1056_p2 = scmp.lt.s32.totalorder %s1054_s29, %s1049_s26 }
  0x12   : > { %p1052_p13 = pnand %p1051_p12, %p1050_p11 }
  0x13   : > { %p1057_p3 = por %p1056_p2, %p1055_p1 }
  0x14   : > { %p1053_p0 = pneg %p1052_p13 }
  0x16   : > { %p1058_p4 = pnand %p1057_p3, %p1053_p0 }
  0x18   : > { %1061 = shalt.err (!%p1058_p4)
}
  0x19   : > { %s1062_s3 = scalar_lea.vmem %s1172_s23, 32  ;;  %s1113_s4 = smov [#allocation2]  }
  0x1a   : > { %p1063_p5 = scmp.ne.s32.totalorder %s1172_s23, %s1062_s3  ;;  %s1067_s5 = sshll.u32 %s1113_s4, 4  ;;  %s1068_s5 = int_to_ptr.vmem [resolvable:$false] %s1067_s5 }
  0x1b   : > { %s1069_s6 = scalar_lea.vmem %s1068_s5, 64  ;;  %p1070_p13 = scmp.lt.s32.totalorder %s1172_s23, %s1068_s5 }
  0x1c   : > { %p1065_p6 = pnand %p1063_p5, %p1051_p12  ;;  %p1071_p9 = scmp.lt.s32.totalorder %s1069_s6, %s1062_s3 }
  0x1e   : > { %p1066_p11 = pneg %p1065_p6  ;;  %p1072_p10 = por %p1071_p9, %p1070_p13 }
  0x20   : > { %p1073_p7 = pnand %p1072_p10, %p1066_p11 }
  0x22   : > { %1076 = shalt.err (!%p1073_p7)
}
  0x23   : > { %1014 = dma.hbm_to_vmem [thread:$0]  (!%p1174_p8), %s1170_s21, 32, %s1172_s23, %s85_s25  }
  0x24   : > { %p1439_p0 = scmp.lt.s32.totalorder %s1111_s9, 3  ;;  %p1440_p1 = scmp.ge.s32.totalorder %s1111_s9, 1 }
  0x26   : > { %p102_p12 = pnand %p1440_p1, %p1439_p0 }
  0x27   : > { %s107_s12 = sand.u32 (!%p102_p12), 1, %s1103_s7   ;;  %p1441_p9 = scmp.ne.s32.totalorder (!%p102_p12), %s1437_s15, 0 }
  0x28   : > { %105 = sbr.rel (%p102_p12) target bundleno = 5449 (0x1549), region = 24  ;;  %s1005_s13 = sshll.u32 (!%p102_p12), %s107_s12, 1 }
  0x29   : > { %s108_s16 = scalar_lea.sflag (!%p102_p12), [#allocation3], %s107_s12  ;;  %s111_s17 = scalar_lea.vmem (!%p102_p12), [#allocation2], %s1005_s13 }
  0x2d   : > { %1094 = dma.done.wait (%p1441_p9), %s108_s16, 32  }
  0x2e   : > { %1096 = vsyncadd (%p1441_p9), %s108_s16, 4294967264  ;;  %v133_v0 = vlaneseq  ;;  %v131_v4 = vld [vmem:[%s111_s17] sm:$0x3]  ;;  %vm151_vm2 = vcmask 1040384   ;;  %v1114_v11 = vmov 0   ;;  %p128_p7 = scmp.lt.s32.totalorder %s1144_s10, 1 }
  0x30   : > { %v134_v1 = vshrl.u32 %v133_v0, 7  ;;  %s1447_s10 = smov (!%p128_p7, %s1144_s10), 1 }
  0x31   : > { %s130_s18 = scalar_lea.vmem %s1435_s1, %s1447_s10 }
  0x32   : > { %v135_v2 = vsub.s32 0, %v134_v1  ;;  %v139_v3 = vsub.s32 1, %v134_v1 }
  0x34   : > { %v136_v5 = vrot.slane %v131_v4, %v135_v2  ;;  %v140_v6 = vrot.slane %v131_v4, %v139_v3 }
  0x36   : > { %vm141_vm0 = vcmp.lt.s32.totalorder %v136_v5, 0  ;;  %vm142_vm1 = vcmp.lt.s32.totalorder %v140_v6, 0  ;;  %v143_v7 = vxor.u32 2147483647, %v136_v5  ;;  %v144_v8 = vxor.u32 2147483647, %v140_v6 }
  0x38   : > { %v1207_v9 = vsel %vm141_vm0, %v143_v7, %v136_v5  ;;  %v1209_v10 = vsel %vm142_vm1, %v144_v8, %v140_v6 }
  0x39   : > { %vm147_vm3 = vcmp.lt.s32.totalorder %v1207_v9, 0  ;;  %vm148_vm4 = vcmp.lt.s32.totalorder %v1209_v10, 0 }
  0x3a   : > { %v149_v12 = vsel %vm147_vm3, 1, %v1114_v11  ;;  %v150_v13 = vsel %vm148_vm4, 1, %v1114_v11 }
  0x3b   : > { %v152_v14 = vsel %vm151_vm2, %v149_v12, 0  ;;  %v153_v15 = vsel %vm151_vm2, %v150_v13, 0 }
  0x3c   : > { %v154_v16 = vadd.s32 %v153_v15, %v152_v14 }
  0x3e   : > { %v156_v17 = vshrl.u32 %v154_v16, 16  ;;  %v155_v18 = vand.u32 65535, %v154_v16 }
  0x40   : > { %v158_v19 = vcvt.s32.f32 %v156_v17  ;;  %v157_v20 = vcvt.s32.f32 %v155_v18 }
  0x42   : > { %161 = vadd.xlane.f32.xlu0 %v158_v19 }
  0x46   : > { %159 = vadd.xlane.f32.xlu0 %v157_v20 }
  0xcb   : > { %v162_v21 = vpop.xlane.xlu0 %161 }
  0xcc   : > { %v164_v22 = vcvt.f32.s32 %v162_v21 }
  0xce   : > { %v165_v24 = vshll.u32 %v164_v22, 16 }
  0xcf   : > { %v160_v23 = vpop.xlane.xlu0 %159 }
  0xd0   : > { %v163_v25 = vcvt.f32.s32 %v160_v23 }
  0xd2   : > { %v166_v26 = vadd.s32 %v165_v24, %v163_v25 }
  0xd4   : > { %vm167_vm5 = vcmp.le.s32.totalorder %v166_v26, 178 }
  0xd5   : > { %v168_v27 = vsel %vm167_vm5, 2147483648, %v1114_v11 }
  0xd6   : > { %v169_v28 = vor.u32 1073741824, %v168_v27 }
  0xd8   : > { %v170_v29 = vxor.u32 2147483648, %v169_v28 }
  0xda   : > { %vm171_vm6 = vcmp.lt.s32.totalorder %v1207_v9, %v170_v29  ;;  %vm172_vm7 = vcmp.lt.s32.totalorder %v1209_v10, %v170_v29 }
  0xdb   : > { %v173_v30 = vsel %vm171_vm6, 1, %v1114_v11  ;;  %v174_v31 = vsel %vm172_vm7, 1, %v1114_v11 }
  0xdc   : > { %v175_v32 = vsel %vm151_vm2, %v173_v30, 0  ;;  %v176_v33 = vsel %vm151_vm2, %v174_v31, 0 }
  0xdd   : > { %v177_v34 = vadd.s32 %v176_v33, %v175_v32 }
  0xdf   : > { %v179_v35 = vshrl.u32 %v177_v34, 16  ;;  %v178_v37 = vand.u32 65535, %v177_v34 }
  0xe1   : > { %v181_v36 = vcvt.s32.f32 %v179_v35  ;;  %v180_v38 = vcvt.s32.f32 %v178_v37 }
  0xe3   : > { %184 = vadd.xlane.f32.xlu1 %v181_v36 }
  0xe7   : > { %182 = vadd.xlane.f32.xlu1 %v180_v38 }
 0x16c   : > { %v185_v39 = vpop.xlane.xlu1 %184 }
 0x16d   : > { %v187_v40 = vcvt.f32.s32 %v185_v39 }
 0x16f   : > { %v188_v42 = vshll.u32 %v187_v40, 16 }
 0x170   : > { %v183_v41 = vpop.xlane.xlu1 %182 }
 0x171   : > { %v186_v43 = vcvt.f32.s32 %v183_v41 }
 0x173   : > { %v189_v44 = vadd.s32 %v188_v42, %v186_v43 }
 0x175   : > { %vm190_vm8 = vcmp.le.s32.totalorder %v189_v44, 178 }
 0x176   : > { %v191_v45 = vsel %vm190_vm8, %v169_v28, %v168_v27 }
 0x177   : > { %v192_v46 = vor.u32 536870912, %v191_v45 }
 0x179   : > { %v193_v47 = vxor.u32 2147483648, %v192_v46 }
 0x17b   : > { %vm194_vm9 = vcmp.lt.s32.totalorder %v1207_v9, %v193_v47  ;;  %vm195_vm10 = vcmp.lt.s32.totalorder %v1209_v10, %v193_v47 }
 0x17c   : > { %v196_v48 = vsel %vm194_vm9, 1, %v1114_v11  ;;  %v197_v49 = vsel %vm195_vm10, 1, %v1114_v11 }
 0x17d   : > { %v198_v50 = vsel %vm151_vm2, %v196_v48, 0  ;;  %v199_v51 = vsel %vm151_vm2, %v197_v49, 0 }
 0x17e   : > { %v200_v52 = vadd.s32 %v199_v51, %v198_v50 }
 0x180   : > { %v202_v53 = vshrl.u32 %v200_v52, 16  ;;  %v201_v54 = vand.u32 65535, %v200_v52 }
 0x182   : > { %v204_v55 = vcvt.s32.f32 %v202_v53  ;;  %v203_v56 = vcvt.s32.f32 %v201_v54 }
 0x184   : > { %207 = vadd.xlane.f32.xlu0 %v204_v55  ;;  %205 = vadd.xlane.f32.xlu1 %v203_v56 }
 0x20d   : > { %v208_v57 = vpop.xlane.xlu0 %207  ;;  %v206_v58 = vpop.xlane.xlu1 %205 }
 0x20e   : > { %v210_v59 = vcvt.f32.s32 %v208_v57  ;;  %v209_v61 = vcvt.f32.s32 %v206_v58 }
 0x210   : > { %v211_v60 = vshll.u32 %v210_v59, 16 }
 0x212   : > { %v212_v62 = vadd.s32 %v211_v60, %v209_v61 }
 0x214   : > { %vm213_vm11 = vcmp.le.s32.totalorder %v212_v62, 178 }
 0x215   : > { %v214_v63 = vsel %vm213_vm11, %v192_v46, %v191_v45 }
 0x216   : > { %v215_v0 = vor.u32 268435456, %v214_v63 }
 0x218   : > { %v216_v1 = vxor.u32 2147483648, %v215_v0 }
 0x21a   : > { %vm217_vm12 = vcmp.lt.s32.totalorder %v1207_v9, %v216_v1  ;;  %vm218_vm13 = vcmp.lt.s32.totalorder %v1209_v10, %v216_v1 }
 0x21b   : > { %v219_v2 = vsel %vm217_vm12, 1, %v1114_v11  ;;  %v220_v3 = vsel %vm218_vm13, 1, %v1114_v11 }
 0x21c   : > { %v221_v4 = vsel %vm151_vm2, %v219_v2, 0  ;;  %v222_v5 = vsel %vm151_vm2, %v220_v3, 0 }
 0x21d   : > { %v223_v6 = vadd.s32 %v222_v5, %v221_v4 }
 0x21f   : > { %v225_v7 = vshrl.u32 %v223_v6, 16  ;;  %v224_v8 = vand.u32 65535, %v223_v6 }
 0x221   : > { %v227_v12 = vcvt.s32.f32 %v225_v7  ;;  %v226_v13 = vcvt.s32.f32 %v224_v8 }
 0x223   : > { %230 = vadd.xlane.f32.xlu0 %v227_v12  ;;  %228 = vadd.xlane.f32.xlu1 %v226_v13 }
 0x2ac   : > { %v231_v14 = vpop.xlane.xlu0 %230  ;;  %v229_v15 = vpop.xlane.xlu1 %228 }
 0x2ad   : > { %v233_v16 = vcvt.f32.s32 %v231_v14  ;;  %v232_v18 = vcvt.f32.s32 %v229_v15 }
 0x2af   : > { %v234_v17 = vshll.u32 %v233_v16, 16 }
 0x2b1   : > { %v235_v19 = vadd.s32 %v234_v17, %v232_v18 }
 0x2b3   : > { %vm236_vm14 = vcmp.le.s32.totalorder %v235_v19, 178 }
 0x2b4   : > { %v237_v20 = vsel %vm236_vm14, %v215_v0, %v214_v63 }
 0x2b5   : > { %v238_v21 = vor.u32 134217728, %v237_v20 }
 0x2b7   : > { %v239_v22 = vxor.u32 2147483648, %v238_v21 }
 0x2b9   : > { %vm240_vm15 = vcmp.lt.s32.totalorder %v1207_v9, %v239_v22  ;;  %vm241_vm0 = vcmp.lt.s32.totalorder %v1209_v10, %v239_v22 }
 0x2ba   : > { %v242_v23 = vsel %vm240_vm15, 1, %v1114_v11  ;;  %v243_v24 = vsel %vm241_vm0, 1, %v1114_v11 }
 0x2bb   : > { %v244_v25 = vsel %vm151_vm2, %v242_v23, 0  ;;  %v245_v26 = vsel %vm151_vm2, %v243_v24, 0 }
 0x2bc   : > { %v246_v27 = vadd.s32 %v245_v26, %v244_v25 }
 0x2be   : > { %v248_v28 = vshrl.u32 %v246_v27, 16  ;;  %v247_v29 = vand.u32 65535, %v246_v27 }
 0x2c0   : > { %v250_v30 = vcvt.s32.f32 %v248_v28  ;;  %v249_v31 = vcvt.s32.f32 %v247_v29 }
 0x2c2   : > { %253 = vadd.xlane.f32.xlu0 %v250_v30  ;;  %251 = vadd.xlane.f32.xlu1 %v249_v31 }
 0x34b   : > { %v254_v32 = vpop.xlane.xlu0 %253  ;;  %v252_v33 = vpop.xlane.xlu1 %251 }
 0x34c   : > { %v256_v34 = vcvt.f32.s32 %v254_v32  ;;  %v255_v36 = vcvt.f32.s32 %v252_v33 }
 0x34e   : > { %v257_v35 = vshll.u32 %v256_v34, 16 }
 0x350   : > { %v258_v37 = vadd.s32 %v257_v35, %v255_v36 }
 0x352   : > { %vm259_vm1 = vcmp.le.s32.totalorder %v258_v37, 178 }
 0x353   : > { %v260_v38 = vsel %vm259_vm1, %v238_v21, %v237_v20 }
 0x354   : > { %v261_v39 = vor.u32 67108864, %v260_v38 }
 0x356   : > { %v262_v40 = vxor.u32 2147483648, %v261_v39 }
 0x358   : > { %vm263_vm3 = vcmp.lt.s32.totalorder %v1207_v9, %v262_v40  ;;  %vm264_vm4 = vcmp.lt.s32.totalorder %v1209_v10, %v262_v40 }
 0x359   : > { %v265_v41 = vsel %vm263_vm3, 1, %v1114_v11  ;;  %v266_v42 = vsel %vm264_vm4, 1, %v1114_v11 }
 0x35a   : > { %v267_v43 = vsel %vm151_vm2, %v265_v41, 0  ;;  %v268_v44 = vsel %vm151_vm2, %v266_v42, 0 }
 0x35b   : > { %v269_v45 = vadd.s32 %v268_v44, %v267_v43 }
 0x35d   : > { %v271_v46 = vshrl.u32 %v269_v45, 16  ;;  %v270_v47 = vand.u32 65535, %v269_v45 }
 0x35f   : > { %v273_v48 = vcvt.s32.f32 %v271_v46  ;;  %v272_v49 = vcvt.s32.f32 %v270_v47 }
 0x361   : > { %276 = vadd.xlane.f32.xlu0 %v273_v48  ;;  %274 = vadd.xlane.f32.xlu1 %v272_v49 }
 0x3ea   : > { %v277_v50 = vpop.xlane.xlu0 %276  ;;  %v275_v51 = vpop.xlane.xlu1 %274 }
 0x3eb   : > { %v279_v52 = vcvt.f32.s32 %v277_v50  ;;  %v278_v54 = vcvt.f32.s32 %v275_v51 }
 0x3ed   : > { %v280_v53 = vshll.u32 %v279_v52, 16 }
 0x3ef   : > { %v281_v55 = vadd.s32 %v280_v53, %v278_v54 }
 0x3f1   : > { %vm282_vm5 = vcmp.le.s32.totalorder %v281_v55, 178 }
 0x3f2   : > { %v283_v56 = vsel %vm282_vm5, %v261_v39, %v260_v38 }
 0x3f3   : > { %v284_v57 = vor.u32 33554432, %v283_v56 }
 0x3f5   : > { %v285_v58 = vxor.u32 2147483648, %v284_v57 }
 0x3f7   : > { %vm286_vm6 = vcmp.lt.s32.totalorder %v1207_v9, %v285_v58  ;;  %vm287_vm7 = vcmp.lt.s32.totalorder %v1209_v10, %v285_v58 }
 0x3f8   : > { %v288_v59 = vsel %vm286_vm6, 1, %v1114_v11  ;;  %v289_v60 = vsel %vm287_vm7, 1, %v1114_v11 }
 0x3f9   : > { %v290_v61 = vsel %vm151_vm2, %v288_v59, 0  ;;  %v291_v62 = vsel %vm151_vm2, %v289_v60, 0 }
 0x3fa   : > { %v292_v63 = vadd.s32 %v291_v62, %v290_v61 }
 0x3fc   : > { %v294_v0 = vshrl.u32 %v292_v63, 16  ;;  %v293_v1 = vand.u32 65535, %v292_v63 }
 0x3fe   : > { %v296_v2 = vcvt.s32.f32 %v294_v0  ;;  %v295_v3 = vcvt.s32.f32 %v293_v1 }
 0x400   : > { %299 = vadd.xlane.f32.xlu0 %v296_v2  ;;  %297 = vadd.xlane.f32.xlu1 %v295_v3 }
 0x489   : > { %v300_v4 = vpop.xlane.xlu0 %299  ;;  %v298_v5 = vpop.xlane.xlu1 %297 }
 0x48a   : > { %v302_v6 = vcvt.f32.s32 %v300_v4  ;;  %v301_v8 = vcvt.f32.s32 %v298_v5 }
 0x48c   : > { %v303_v7 = vshll.u32 %v302_v6, 16 }
 0x48e   : > { %v304_v12 = vadd.s32 %v303_v7, %v301_v8 }
 0x490   : > { %vm305_vm8 = vcmp.le.s32.totalorder %v304_v12, 178 }
 0x491   : > { %v306_v13 = vsel %vm305_vm8, %v284_v57, %v283_v56 }
 0x492   : > { %v307_v14 = vor.u32 16777216, %v306_v13 }
 0x494   : > { %v308_v15 = vxor.u32 2147483648, %v307_v14 }
 0x496   : > { %vm309_vm9 = vcmp.lt.s32.totalorder %v1207_v9, %v308_v15  ;;  %vm310_vm10 = vcmp.lt.s32.totalorder %v1209_v10, %v308_v15 }
 0x497   : > { %v311_v16 = vsel %vm309_vm9, 1, %v1114_v11  ;;  %v312_v17 = vsel %vm310_vm10, 1, %v1114_v11 }
 0x498   : > { %v313_v18 = vsel %vm151_vm2, %v311_v16, 0  ;;  %v314_v19 = vsel %vm151_vm2, %v312_v17, 0 }
 0x499   : > { %v315_v20 = vadd.s32 %v314_v19, %v313_v18 }
 0x49b   : > { %v317_v21 = vshrl.u32 %v315_v20, 16  ;;  %v316_v22 = vand.u32 65535, %v315_v20 }
 0x49d   : > { %v319_v23 = vcvt.s32.f32 %v317_v21  ;;  %v318_v24 = vcvt.s32.f32 %v316_v22 }
 0x49f   : > { %322 = vadd.xlane.f32.xlu0 %v319_v23  ;;  %320 = vadd.xlane.f32.xlu1 %v318_v24 }
 0x528   : > { %v323_v25 = vpop.xlane.xlu0 %322  ;;  %v321_v26 = vpop.xlane.xlu1 %320 }
 0x529   : > { %v325_v27 = vcvt.f32.s32 %v323_v25  ;;  %v324_v29 = vcvt.f32.s32 %v321_v26 }
 0x52b   : > { %v326_v28 = vshll.u32 %v325_v27, 16 }
 0x52d   : > { %v327_v30 = vadd.s32 %v326_v28, %v324_v29 }
 0x52f   : > { %vm328_vm11 = vcmp.le.s32.totalorder %v327_v30, 178 }
 0x530   : > { %v329_v31 = vsel %vm328_vm11, %v307_v14, %v306_v13 }
 0x531   : > { %v330_v32 = vor.u32 8388608, %v329_v31 }
 0x533   : > { %v331_v33 = vxor.u32 2147483648, %v330_v32 }
 0x535   : > { %vm332_vm12 = vcmp.lt.s32.totalorder %v1207_v9, %v331_v33  ;;  %vm333_vm13 = vcmp.lt.s32.totalorder %v1209_v10, %v331_v33 }
 0x536   : > { %v334_v34 = vsel %vm332_vm12, 1, %v1114_v11  ;;  %v335_v35 = vsel %vm333_vm13, 1, %v1114_v11 }
 0x537   : > { %v336_v36 = vsel %vm151_vm2, %v334_v34, 0  ;;  %v337_v37 = vsel %vm151_vm2, %v335_v35, 0 }
 0x538   : > { %v338_v38 = vadd.s32 %v337_v37, %v336_v36 }
 0x53a   : > { %v340_v39 = vshrl.u32 %v338_v38, 16  ;;  %v339_v40 = vand.u32 65535, %v338_v38 }
 0x53c   : > { %v342_v41 = vcvt.s32.f32 %v340_v39  ;;  %v341_v42 = vcvt.s32.f32 %v339_v40 }
 0x53e   : > { %345 = vadd.xlane.f32.xlu0 %v342_v41  ;;  %343 = vadd.xlane.f32.xlu1 %v341_v42 }
 0x5c7   : > { %v346_v43 = vpop.xlane.xlu0 %345  ;;  %v344_v44 = vpop.xlane.xlu1 %343 }
 0x5c8   : > { %v348_v45 = vcvt.f32.s32 %v346_v43  ;;  %v347_v47 = vcvt.f32.s32 %v344_v44 }
 0x5ca   : > { %v349_v46 = vshll.u32 %v348_v45, 16 }
 0x5cc   : > { %v350_v48 = vadd.s32 %v349_v46, %v347_v47 }
 0x5ce   : > { %vm351_vm14 = vcmp.le.s32.totalorder %v350_v48, 178 }
 0x5cf   : > { %v352_v49 = vsel %vm351_vm14, %v330_v32, %v329_v31 }
 0x5d0   : > { %v353_v50 = vor.u32 4194304, %v352_v49 }
 0x5d2   : > { %v354_v51 = vxor.u32 2147483648, %v353_v50 }
 0x5d4   : > { %vm355_vm15 = vcmp.lt.s32.totalorder %v1207_v9, %v354_v51  ;;  %vm356_vm0 = vcmp.lt.s32.totalorder %v1209_v10, %v354_v51 }
 0x5d5   : > { %v357_v52 = vsel %vm355_vm15, 1, %v1114_v11  ;;  %v358_v53 = vsel %vm356_vm0, 1, %v1114_v11 }
 0x5d6   : > { %v359_v54 = vsel %vm151_vm2, %v357_v52, 0  ;;  %v360_v55 = vsel %vm151_vm2, %v358_v53, 0 }
 0x5d7   : > { %v361_v56 = vadd.s32 %v360_v55, %v359_v54 }
 0x5d9   : > { %v363_v57 = vshrl.u32 %v361_v56, 16  ;;  %v362_v58 = vand.u32 65535, %v361_v56 }
 0x5db   : > { %v365_v59 = vcvt.s32.f32 %v363_v57  ;;  %v364_v60 = vcvt.s32.f32 %v362_v58 }
 0x5dd   : > { %368 = vadd.xlane.f32.xlu0 %v365_v59  ;;  %366 = vadd.xlane.f32.xlu1 %v364_v60 }
 0x666   : > { %v369_v61 = vpop.xlane.xlu0 %368  ;;  %v367_v62 = vpop.xlane.xlu1 %366 }
 0x667   : > { %v371_v63 = vcvt.f32.s32 %v369_v61  ;;  %v370_v1 = vcvt.f32.s32 %v367_v62 }
 0x669   : > { %v372_v0 = vshll.u32 %v371_v63, 16 }
 0x66b   : > { %v373_v2 = vadd.s32 %v372_v0, %v370_v1 }
 0x66d   : > { %vm374_vm1 = vcmp.le.s32.totalorder %v373_v2, 178 }
 0x66e   : > { %v375_v3 = vsel %vm374_vm1, %v353_v50, %v352_v49 }
 0x66f   : > { %v376_v4 = vor.u32 2097152, %v375_v3 }
 0x671   : > { %v377_v5 = vxor.u32 2147483648, %v376_v4 }
 0x673   : > { %vm378_vm3 = vcmp.lt.s32.totalorder %v1207_v9, %v377_v5  ;;  %vm379_vm4 = vcmp.lt.s32.totalorder %v1209_v10, %v377_v5 }
 0x674   : > { %v380_v6 = vsel %vm378_vm3, 1, %v1114_v11  ;;  %v381_v7 = vsel %vm379_vm4, 1, %v1114_v11 }
 0x675   : > { %v382_v8 = vsel %vm151_vm2, %v380_v6, 0  ;;  %v383_v12 = vsel %vm151_vm2, %v381_v7, 0 }
 0x676   : > { %v384_v13 = vadd.s32 %v383_v12, %v382_v8 }
 0x678   : > { %v386_v14 = vshrl.u32 %v384_v13, 16  ;;  %v385_v15 = vand.u32 65535, %v384_v13 }
 0x67a   : > { %v388_v16 = vcvt.s32.f32 %v386_v14  ;;  %v387_v17 = vcvt.s32.f32 %v385_v15 }
 0x67c   : > { %391 = vadd.xlane.f32.xlu0 %v388_v16  ;;  %389 = vadd.xlane.f32.xlu1 %v387_v17 }
 0x705   : > { %v392_v18 = vpop.xlane.xlu0 %391  ;;  %v390_v19 = vpop.xlane.xlu1 %389 }
 0x706   : > { %v394_v20 = vcvt.f32.s32 %v392_v18  ;;  %v393_v22 = vcvt.f32.s32 %v390_v19 }
 0x708   : > { %v395_v21 = vshll.u32 %v394_v20, 16 }
 0x70a   : > { %v396_v23 = vadd.s32 %v395_v21, %v393_v22 }
 0x70c   : > { %vm397_vm5 = vcmp.le.s32.totalorder %v396_v23, 178 }
 0x70d   : > { %v398_v24 = vsel %vm397_vm5, %v376_v4, %v375_v3 }
 0x70e   : > { %v399_v25 = vor.u32 1048576, %v398_v24 }
 0x710   : > { %v400_v26 = vxor.u32 2147483648, %v399_v25 }
 0x712   : > { %vm401_vm6 = vcmp.lt.s32.totalorder %v1207_v9, %v400_v26  ;;  %vm402_vm7 = vcmp.lt.s32.totalorder %v1209_v10, %v400_v26 }
 0x713   : > { %v403_v27 = vsel %vm401_vm6, 1, %v1114_v11  ;;  %v404_v28 = vsel %vm402_vm7, 1, %v1114_v11 }
 0x714   : > { %v405_v29 = vsel %vm151_vm2, %v403_v27, 0  ;;  %v406_v30 = vsel %vm151_vm2, %v404_v28, 0 }
 0x715   : > { %v407_v31 = vadd.s32 %v406_v30, %v405_v29 }
 0x717   : > { %v409_v32 = vshrl.u32 %v407_v31, 16  ;;  %v408_v33 = vand.u32 65535, %v407_v31 }
 0x719   : > { %v411_v34 = vcvt.s32.f32 %v409_v32  ;;  %v410_v35 = vcvt.s32.f32 %v408_v33 }
 0x71b   : > { %414 = vadd.xlane.f32.xlu0 %v411_v34  ;;  %412 = vadd.xlane.f32.xlu1 %v410_v35 }
 0x7a4   : > { %v415_v36 = vpop.xlane.xlu0 %414  ;;  %v413_v37 = vpop.xlane.xlu1 %412 }
 0x7a5   : > { %v417_v38 = vcvt.f32.s32 %v415_v36  ;;  %v416_v40 = vcvt.f32.s32 %v413_v37 }
 0x7a7   : > { %v418_v39 = vshll.u32 %v417_v38, 16 }
 0x7a9   : > { %v419_v41 = vadd.s32 %v418_v39, %v416_v40 }
 0x7ab   : > { %vm420_vm8 = vcmp.le.s32.totalorder %v419_v41, 178 }
 0x7ac   : > { %v421_v42 = vsel %vm420_vm8, %v399_v25, %v398_v24 }
 0x7ad   : > { %v422_v43 = vor.u32 524288, %v421_v42 }
 0x7af   : > { %v423_v44 = vxor.u32 2147483648, %v422_v43 }
 0x7b1   : > { %vm424_vm9 = vcmp.lt.s32.totalorder %v1207_v9, %v423_v44  ;;  %vm425_vm10 = vcmp.lt.s32.totalorder %v1209_v10, %v423_v44 }
 0x7b2   : > { %v426_v45 = vsel %vm424_vm9, 1, %v1114_v11  ;;  %v427_v46 = vsel %vm425_vm10, 1, %v1114_v11 }
 0x7b3   : > { %v428_v47 = vsel %vm151_vm2, %v426_v45, 0  ;;  %v429_v48 = vsel %vm151_vm2, %v427_v46, 0 }
 0x7b4   : > { %v430_v49 = vadd.s32 %v429_v48, %v428_v47 }
 0x7b6   : > { %v432_v50 = vshrl.u32 %v430_v49, 16  ;;  %v431_v51 = vand.u32 65535, %v430_v49 }
 0x7b8   : > { %v434_v52 = vcvt.s32.f32 %v432_v50  ;;  %v433_v53 = vcvt.s32.f32 %v431_v51 }
 0x7ba   : > { %437 = vadd.xlane.f32.xlu0 %v434_v52  ;;  %435 = vadd.xlane.f32.xlu1 %v433_v53 }
 0x843   : > { %v438_v54 = vpop.xlane.xlu0 %437  ;;  %v436_v55 = vpop.xlane.xlu1 %435 }
 0x844   : > { %v440_v56 = vcvt.f32.s32 %v438_v54  ;;  %v439_v58 = vcvt.f32.s32 %v436_v55 }
 0x846   : > { %v441_v57 = vshll.u32 %v440_v56, 16 }
 0x848   : > { %v442_v59 = vadd.s32 %v441_v57, %v439_v58 }
 0x84a   : > { %vm443_vm11 = vcmp.le.s32.totalorder %v442_v59, 178 }
 0x84b   : > { %v444_v60 = vsel %vm443_vm11, %v422_v43, %v421_v42 }
 0x84c   : > { %v445_v61 = vor.u32 262144, %v444_v60 }
 0x84e   : > { %v446_v62 = vxor.u32 2147483648, %v445_v61 }
 0x850   : > { %vm447_vm12 = vcmp.lt.s32.totalorder %v1207_v9, %v446_v62  ;;  %vm448_vm13 = vcmp.lt.s32.totalorder %v1209_v10, %v446_v62 }
 0x851   : > { %v449_v63 = vsel %vm447_vm12, 1, %v1114_v11  ;;  %v450_v0 = vsel %vm448_vm13, 1, %v1114_v11 }
 0x852   : > { %v451_v1 = vsel %vm151_vm2, %v449_v63, 0  ;;  %v452_v2 = vsel %vm151_vm2, %v450_v0, 0 }
 0x853   : > { %v453_v3 = vadd.s32 %v452_v2, %v451_v1 }
 0x855   : > { %v455_v4 = vshrl.u32 %v453_v3, 16  ;;  %v454_v5 = vand.u32 65535, %v453_v3 }
 0x857   : > { %v457_v6 = vcvt.s32.f32 %v455_v4  ;;  %v456_v7 = vcvt.s32.f32 %v454_v5 }
 0x859   : > { %460 = vadd.xlane.f32.xlu0 %v457_v6  ;;  %458 = vadd.xlane.f32.xlu1 %v456_v7 }
 0x8e2   : > { %v461_v8 = vpop.xlane.xlu0 %460  ;;  %v459_v12 = vpop.xlane.xlu1 %458 }
 0x8e3   : > { %v463_v13 = vcvt.f32.s32 %v461_v8  ;;  %v462_v15 = vcvt.f32.s32 %v459_v12 }
 0x8e5   : > { %v464_v14 = vshll.u32 %v463_v13, 16 }
 0x8e7   : > { %v465_v16 = vadd.s32 %v464_v14, %v462_v15 }
 0x8e9   : > { %vm466_vm14 = vcmp.le.s32.totalorder %v465_v16, 178 }
 0x8ea   : > { %v467_v17 = vsel %vm466_vm14, %v445_v61, %v444_v60 }
 0x8eb   : > { %v468_v18 = vor.u32 131072, %v467_v17 }
 0x8ed   : > { %v469_v19 = vxor.u32 2147483648, %v468_v18 }
 0x8ef   : > { %vm470_vm15 = vcmp.lt.s32.totalorder %v1207_v9, %v469_v19  ;;  %vm471_vm0 = vcmp.lt.s32.totalorder %v1209_v10, %v469_v19 }
 0x8f0   : > { %v472_v20 = vsel %vm470_vm15, 1, %v1114_v11  ;;  %v473_v21 = vsel %vm471_vm0, 1, %v1114_v11 }
 0x8f1   : > { %v474_v22 = vsel %vm151_vm2, %v472_v20, 0  ;;  %v475_v23 = vsel %vm151_vm2, %v473_v21, 0 }
 0x8f2   : > { %v476_v24 = vadd.s32 %v475_v23, %v474_v22 }
 0x8f4   : > { %v478_v25 = vshrl.u32 %v476_v24, 16  ;;  %v477_v26 = vand.u32 65535, %v476_v24 }
 0x8f6   : > { %v480_v27 = vcvt.s32.f32 %v478_v25  ;;  %v479_v28 = vcvt.s32.f32 %v477_v26 }
 0x8f8   : > { %483 = vadd.xlane.f32.xlu0 %v480_v27  ;;  %481 = vadd.xlane.f32.xlu1 %v479_v28 }
 0x981   : > { %v484_v29 = vpop.xlane.xlu0 %483  ;;  %v482_v30 = vpop.xlane.xlu1 %481 }
 0x982   : > { %v486_v31 = vcvt.f32.s32 %v484_v29  ;;  %v485_v33 = vcvt.f32.s32 %v482_v30 }
 0x984   : > { %v487_v32 = vshll.u32 %v486_v31, 16 }
 0x986   : > { %v488_v34 = vadd.s32 %v487_v32, %v485_v33 }
 0x988   : > { %vm489_vm1 = vcmp.le.s32.totalorder %v488_v34, 178 }
 0x989   : > { %v490_v35 = vsel %vm489_vm1, %v468_v18, %v467_v17 }
 0x98a   : > { %v491_v36 = vor.u32 65536, %v490_v35 }
 0x98c   : > { %v492_v37 = vxor.u32 2147483648, %v491_v36 }
 0x98e   : > { %vm493_vm3 = vcmp.lt.s32.totalorder %v1207_v9, %v492_v37  ;;  %vm494_vm4 = vcmp.lt.s32.totalorder %v1209_v10, %v492_v37 }
 0x98f   : > { %v495_v38 = vsel %vm493_vm3, 1, %v1114_v11  ;;  %v496_v39 = vsel %vm494_vm4, 1, %v1114_v11 }
 0x990   : > { %v497_v40 = vsel %vm151_vm2, %v495_v38, 0  ;;  %v498_v41 = vsel %vm151_vm2, %v496_v39, 0 }
 0x991   : > { %v499_v42 = vadd.s32 %v498_v41, %v497_v40 }
 0x993   : > { %v501_v43 = vshrl.u32 %v499_v42, 16  ;;  %v500_v44 = vand.u32 65535, %v499_v42 }
 0x995   : > { %v503_v45 = vcvt.s32.f32 %v501_v43  ;;  %v502_v46 = vcvt.s32.f32 %v500_v44 }
 0x997   : > { %506 = vadd.xlane.f32.xlu0 %v503_v45  ;;  %504 = vadd.xlane.f32.xlu1 %v502_v46 }
 0xa20   : > { %v507_v47 = vpop.xlane.xlu0 %506  ;;  %v505_v48 = vpop.xlane.xlu1 %504 }
 0xa21   : > { %v509_v49 = vcvt.f32.s32 %v507_v47  ;;  %v508_v51 = vcvt.f32.s32 %v505_v48 }
 0xa23   : > { %v510_v50 = vshll.u32 %v509_v49, 16 }
 0xa25   : > { %v511_v52 = vadd.s32 %v510_v50, %v508_v51 }
 0xa27   : > { %vm512_vm5 = vcmp.le.s32.totalorder %v511_v52, 178 }
 0xa28   : > { %v513_v53 = vsel %vm512_vm5, %v491_v36, %v490_v35 }
 0xa29   : > { %v514_v54 = vor.u32 32768, %v513_v53 }
 0xa2b   : > { %v515_v55 = vxor.u32 2147483648, %v514_v54 }
 0xa2d   : > { %vm516_vm6 = vcmp.lt.s32.totalorder %v1207_v9, %v515_v55  ;;  %vm517_vm7 = vcmp.lt.s32.totalorder %v1209_v10, %v515_v55 }
 0xa2e   : > { %v518_v56 = vsel %vm516_vm6, 1, %v1114_v11  ;;  %v519_v57 = vsel %vm517_vm7, 1, %v1114_v11 }
 0xa2f   : > { %v520_v58 = vsel %vm151_vm2, %v518_v56, 0  ;;  %v521_v59 = vsel %vm151_vm2, %v519_v57, 0 }
 0xa30   : > { %v522_v60 = vadd.s32 %v521_v59, %v520_v58 }
 0xa32   : > { %v524_v61 = vshrl.u32 %v522_v60, 16  ;;  %v523_v62 = vand.u32 65535, %v522_v60 }
 0xa34   : > { %v526_v63 = vcvt.s32.f32 %v524_v61  ;;  %v525_v0 = vcvt.s32.f32 %v523_v62 }
 0xa36   : > { %529 = vadd.xlane.f32.xlu0 %v526_v63  ;;  %527 = vadd.xlane.f32.xlu1 %v525_v0 }
 0xabf   : > { %v530_v1 = vpop.xlane.xlu0 %529  ;;  %v528_v2 = vpop.xlane.xlu1 %527 }
 0xac0   : > { %v532_v3 = vcvt.f32.s32 %v530_v1  ;;  %v531_v5 = vcvt.f32.s32 %v528_v2 }
 0xac2   : > { %v533_v4 = vshll.u32 %v532_v3, 16 }
 0xac4   : > { %v534_v6 = vadd.s32 %v533_v4, %v531_v5 }
 0xac6   : > { %vm535_vm8 = vcmp.le.s32.totalorder %v534_v6, 178 }
 0xac7   : > { %v536_v7 = vsel %vm535_vm8, %v514_v54, %v513_v53 }
 0xac8   : > { %v537_v8 = vor.u32 16384, %v536_v7 }
 0xaca   : > { %v538_v12 = vxor.u32 2147483648, %v537_v8 }
 0xacc   : > { %vm539_vm9 = vcmp.lt.s32.totalorder %v1207_v9, %v538_v12  ;;  %vm540_vm10 = vcmp.lt.s32.totalorder %v1209_v10, %v538_v12 }
 0xacd   : > { %v541_v13 = vsel %vm539_vm9, 1, %v1114_v11  ;;  %v542_v14 = vsel %vm540_vm10, 1, %v1114_v11 }
 0xace   : > { %v543_v15 = vsel %vm151_vm2, %v541_v13, 0  ;;  %v544_v16 = vsel %vm151_vm2, %v542_v14, 0 }
 0xacf   : > { %v545_v17 = vadd.s32 %v544_v16, %v543_v15 }
 0xad1   : > { %v547_v18 = vshrl.u32 %v545_v17, 16  ;;  %v546_v19 = vand.u32 65535, %v545_v17 }
 0xad3   : > { %v549_v20 = vcvt.s32.f32 %v547_v18  ;;  %v548_v21 = vcvt.s32.f32 %v546_v19 }
 0xad5   : > { %552 = vadd.xlane.f32.xlu0 %v549_v20  ;;  %550 = vadd.xlane.f32.xlu1 %v548_v21 }
 0xb5e   : > { %v553_v22 = vpop.xlane.xlu0 %552  ;;  %v551_v23 = vpop.xlane.xlu1 %550 }
 0xb5f   : > { %v555_v24 = vcvt.f32.s32 %v553_v22  ;;  %v554_v26 = vcvt.f32.s32 %v551_v23 }
 0xb61   : > { %v556_v25 = vshll.u32 %v555_v24, 16 }
 0xb63   : > { %v557_v27 = vadd.s32 %v556_v25, %v554_v26 }
 0xb65   : > { %vm558_vm11 = vcmp.le.s32.totalorder %v557_v27, 178 }
 0xb66   : > { %v559_v28 = vsel %vm558_vm11, %v537_v8, %v536_v7 }
 0xb67   : > { %v560_v29 = vor.u32 8192, %v559_v28 }
 0xb69   : > { %v561_v30 = vxor.u32 2147483648, %v560_v29 }
 0xb6b   : > { %vm562_vm12 = vcmp.lt.s32.totalorder %v1207_v9, %v561_v30  ;;  %vm563_vm13 = vcmp.lt.s32.totalorder %v1209_v10, %v561_v30 }
 0xb6c   : > { %v564_v31 = vsel %vm562_vm12, 1, %v1114_v11  ;;  %v565_v32 = vsel %vm563_vm13, 1, %v1114_v11 }
 0xb6d   : > { %v566_v33 = vsel %vm151_vm2, %v564_v31, 0  ;;  %v567_v34 = vsel %vm151_vm2, %v565_v32, 0 }
 0xb6e   : > { %v568_v35 = vadd.s32 %v567_v34, %v566_v33 }
 0xb70   : > { %v570_v36 = vshrl.u32 %v568_v35, 16  ;;  %v569_v37 = vand.u32 65535, %v568_v35 }
 0xb72   : > { %v572_v38 = vcvt.s32.f32 %v570_v36  ;;  %v571_v39 = vcvt.s32.f32 %v569_v37 }
 0xb74   : > { %575 = vadd.xlane.f32.xlu0 %v572_v38  ;;  %573 = vadd.xlane.f32.xlu1 %v571_v39 }
 0xbfd   : > { %v576_v40 = vpop.xlane.xlu0 %575  ;;  %v574_v41 = vpop.xlane.xlu1 %573 }
 0xbfe   : > { %v578_v42 = vcvt.f32.s32 %v576_v40  ;;  %v577_v44 = vcvt.f32.s32 %v574_v41 }
 0xc00   : > { %v579_v43 = vshll.u32 %v578_v42, 16 }
 0xc02   : > { %v580_v45 = vadd.s32 %v579_v43, %v577_v44 }
 0xc04   : > { %vm581_vm14 = vcmp.le.s32.totalorder %v580_v45, 178 }
 0xc05   : > { %v582_v46 = vsel %vm581_vm14, %v560_v29, %v559_v28 }
 0xc06   : > { %v583_v47 = vor.u32 4096, %v582_v46 }
 0xc08   : > { %v584_v48 = vxor.u32 2147483648, %v583_v47 }
 0xc0a   : > { %vm585_vm15 = vcmp.lt.s32.totalorder %v1207_v9, %v584_v48  ;;  %vm586_vm0 = vcmp.lt.s32.totalorder %v1209_v10, %v584_v48 }
 0xc0b   : > { %v587_v49 = vsel %vm585_vm15, 1, %v1114_v11  ;;  %v588_v50 = vsel %vm586_vm0, 1, %v1114_v11 }
 0xc0c   : > { %v589_v51 = vsel %vm151_vm2, %v587_v49, 0  ;;  %v590_v52 = vsel %vm151_vm2, %v588_v50, 0 }
 0xc0d   : > { %v591_v53 = vadd.s32 %v590_v52, %v589_v51 }
 0xc0f   : > { %v593_v54 = vshrl.u32 %v591_v53, 16  ;;  %v592_v55 = vand.u32 65535, %v591_v53 }
 0xc11   : > { %v595_v56 = vcvt.s32.f32 %v593_v54  ;;  %v594_v57 = vcvt.s32.f32 %v592_v55 }
 0xc13   : > { %598 = vadd.xlane.f32.xlu0 %v595_v56  ;;  %596 = vadd.xlane.f32.xlu1 %v594_v57 }
 0xc9c   : > { %v599_v58 = vpop.xlane.xlu0 %598  ;;  %v597_v59 = vpop.xlane.xlu1 %596 }
 0xc9d   : > { %v601_v60 = vcvt.f32.s32 %v599_v58  ;;  %v600_v62 = vcvt.f32.s32 %v597_v59 }
 0xc9f   : > { %v602_v61 = vshll.u32 %v601_v60, 16 }
 0xca1   : > { %v603_v63 = vadd.s32 %v602_v61, %v600_v62 }
 0xca3   : > { %vm604_vm1 = vcmp.le.s32.totalorder %v603_v63, 178 }
 0xca4   : > { %v605_v0 = vsel %vm604_vm1, %v583_v47, %v582_v46 }
 0xca5   : > { %v606_v1 = vor.u32 2048, %v605_v0 }
 0xca7   : > { %v607_v2 = vxor.u32 2147483648, %v606_v1 }
 0xca9   : > { %vm608_vm3 = vcmp.lt.s32.totalorder %v1207_v9, %v607_v2  ;;  %vm609_vm4 = vcmp.lt.s32.totalorder %v1209_v10, %v607_v2 }
 0xcaa   : > { %v610_v3 = vsel %vm608_vm3, 1, %v1114_v11  ;;  %v611_v4 = vsel %vm609_vm4, 1, %v1114_v11 }
 0xcab   : > { %v612_v5 = vsel %vm151_vm2, %v610_v3, 0  ;;  %v613_v6 = vsel %vm151_vm2, %v611_v4, 0 }
 0xcac   : > { %v614_v7 = vadd.s32 %v613_v6, %v612_v5 }
 0xcae   : > { %v616_v8 = vshrl.u32 %v614_v7, 16  ;;  %v615_v12 = vand.u32 65535, %v614_v7 }
 0xcb0   : > { %v618_v13 = vcvt.s32.f32 %v616_v8  ;;  %v617_v14 = vcvt.s32.f32 %v615_v12 }
 0xcb2   : > { %621 = vadd.xlane.f32.xlu0 %v618_v13  ;;  %619 = vadd.xlane.f32.xlu1 %v617_v14 }
 0xd3b   : > { %v622_v15 = vpop.xlane.xlu0 %621  ;;  %v620_v16 = vpop.xlane.xlu1 %619 }
 0xd3c   : > { %v624_v17 = vcvt.f32.s32 %v622_v15  ;;  %v623_v19 = vcvt.f32.s32 %v620_v16 }
 0xd3e   : > { %v625_v18 = vshll.u32 %v624_v17, 16 }
 0xd40   : > { %v626_v20 = vadd.s32 %v625_v18, %v623_v19 }
 0xd42   : > { %vm627_vm5 = vcmp.le.s32.totalorder %v626_v20, 178 }
 0xd43   : > { %v628_v21 = vsel %vm627_vm5, %v606_v1, %v605_v0 }
 0xd44   : > { %v629_v22 = vor.u32 1024, %v628_v21 }
 0xd46   : > { %v630_v23 = vxor.u32 2147483648, %v629_v22 }
 0xd48   : > { %vm631_vm6 = vcmp.lt.s32.totalorder %v1207_v9, %v630_v23  ;;  %vm632_vm7 = vcmp.lt.s32.totalorder %v1209_v10, %v630_v23 }
 0xd49   : > { %v633_v24 = vsel %vm631_vm6, 1, %v1114_v11  ;;  %v634_v25 = vsel %vm632_vm7, 1, %v1114_v11 }
 0xd4a   : > { %v635_v26 = vsel %vm151_vm2, %v633_v24, 0  ;;  %v636_v27 = vsel %vm151_vm2, %v634_v25, 0 }
 0xd4b   : > { %v637_v28 = vadd.s32 %v636_v27, %v635_v26 }
 0xd4d   : > { %v639_v29 = vshrl.u32 %v637_v28, 16  ;;  %v638_v30 = vand.u32 65535, %v637_v28 }
 0xd4f   : > { %v641_v31 = vcvt.s32.f32 %v639_v29  ;;  %v640_v32 = vcvt.s32.f32 %v638_v30 }
 0xd51   : > { %644 = vadd.xlane.f32.xlu0 %v641_v31  ;;  %642 = vadd.xlane.f32.xlu1 %v640_v32 }
 0xdda   : > { %v645_v33 = vpop.xlane.xlu0 %644  ;;  %v643_v34 = vpop.xlane.xlu1 %642 }
 0xddb   : > { %v647_v35 = vcvt.f32.s32 %v645_v33  ;;  %v646_v37 = vcvt.f32.s32 %v643_v34 }
 0xddd   : > { %v648_v36 = vshll.u32 %v647_v35, 16 }
 0xddf   : > { %v649_v38 = vadd.s32 %v648_v36, %v646_v37 }
 0xde1   : > { %vm650_vm8 = vcmp.le.s32.totalorder %v649_v38, 178 }
 0xde2   : > { %v651_v39 = vsel %vm650_vm8, %v629_v22, %v628_v21 }
 0xde3   : > { %v652_v40 = vor.u32 512, %v651_v39 }
 0xde5   : > { %v653_v41 = vxor.u32 2147483648, %v652_v40 }
 0xde7   : > { %vm654_vm9 = vcmp.lt.s32.totalorder %v1207_v9, %v653_v41  ;;  %vm655_vm10 = vcmp.lt.s32.totalorder %v1209_v10, %v653_v41 }
 0xde8   : > { %v656_v42 = vsel %vm654_vm9, 1, %v1114_v11  ;;  %v657_v43 = vsel %vm655_vm10, 1, %v1114_v11 }
 0xde9   : > { %v658_v44 = vsel %vm151_vm2, %v656_v42, 0  ;;  %v659_v45 = vsel %vm151_vm2, %v657_v43, 0 }
 0xdea   : > { %v660_v46 = vadd.s32 %v659_v45, %v658_v44 }
 0xdec   : > { %v662_v47 = vshrl.u32 %v660_v46, 16  ;;  %v661_v48 = vand.u32 65535, %v660_v46 }
 0xdee   : > { %v664_v49 = vcvt.s32.f32 %v662_v47  ;;  %v663_v50 = vcvt.s32.f32 %v661_v48 }
 0xdf0   : > { %667 = vadd.xlane.f32.xlu0 %v664_v49  ;;  %665 = vadd.xlane.f32.xlu1 %v663_v50 }
 0xe79   : > { %v668_v51 = vpop.xlane.xlu0 %667  ;;  %v666_v52 = vpop.xlane.xlu1 %665 }
 0xe7a   : > { %v670_v53 = vcvt.f32.s32 %v668_v51  ;;  %v669_v55 = vcvt.f32.s32 %v666_v52 }
 0xe7c   : > { %v671_v54 = vshll.u32 %v670_v53, 16 }
 0xe7e   : > { %v672_v56 = vadd.s32 %v671_v54, %v669_v55 }
 0xe80   : > { %vm673_vm11 = vcmp.le.s32.totalorder %v672_v56, 178 }
 0xe81   : > { %v674_v57 = vsel %vm673_vm11, %v652_v40, %v651_v39 }
 0xe82   : > { %v675_v58 = vor.u32 256, %v674_v57 }
 0xe84   : > { %v676_v59 = vxor.u32 2147483648, %v675_v58 }
 0xe86   : > { %vm677_vm12 = vcmp.lt.s32.totalorder %v1207_v9, %v676_v59  ;;  %vm678_vm13 = vcmp.lt.s32.totalorder %v1209_v10, %v676_v59 }
 0xe87   : > { %v679_v60 = vsel %vm677_vm12, 1, %v1114_v11  ;;  %v680_v61 = vsel %vm678_vm13, 1, %v1114_v11 }
 0xe88   : > { %v681_v62 = vsel %vm151_vm2, %v679_v60, 0  ;;  %v682_v63 = vsel %vm151_vm2, %v680_v61, 0 }
 0xe89   : > { %v683_v0 = vadd.s32 %v682_v63, %v681_v62 }
 0xe8b   : > { %v685_v1 = vshrl.u32 %v683_v0, 16  ;;  %v684_v2 = vand.u32 65535, %v683_v0 }
 0xe8d   : > { %v687_v3 = vcvt.s32.f32 %v685_v1  ;;  %v686_v4 = vcvt.s32.f32 %v684_v2 }
 0xe8f   : > { %690 = vadd.xlane.f32.xlu0 %v687_v3  ;;  %688 = vadd.xlane.f32.xlu1 %v686_v4 }
 0xf18   : > { %v691_v5 = vpop.xlane.xlu0 %690  ;;  %v689_v6 = vpop.xlane.xlu1 %688 }
 0xf19   : > { %v693_v7 = vcvt.f32.s32 %v691_v5  ;;  %v692_v12 = vcvt.f32.s32 %v689_v6 }
 0xf1b   : > { %v694_v8 = vshll.u32 %v693_v7, 16 }
 0xf1d   : > { %v695_v13 = vadd.s32 %v694_v8, %v692_v12 }
 0xf1f   : > { %vm696_vm14 = vcmp.le.s32.totalorder %v695_v13, 178 }
 0xf20   : > { %v697_v14 = vsel %vm696_vm14, %v675_v58, %v674_v57 }
 0xf21   : > { %v698_v15 = vor.u32 128, %v697_v14 }
 0xf23   : > { %v699_v16 = vxor.u32 2147483648, %v698_v15 }
 0xf25   : > { %vm700_vm15 = vcmp.lt.s32.totalorder %v1207_v9, %v699_v16  ;;  %vm701_vm0 = vcmp.lt.s32.totalorder %v1209_v10, %v699_v16 }
 0xf26   : > { %v702_v17 = vsel %vm700_vm15, 1, %v1114_v11  ;;  %v703_v18 = vsel %vm701_vm0, 1, %v1114_v11 }
 0xf27   : > { %v704_v19 = vsel %vm151_vm2, %v702_v17, 0  ;;  %v705_v20 = vsel %vm151_vm2, %v703_v18, 0 }
 0xf28   : > { %v706_v21 = vadd.s32 %v705_v20, %v704_v19 }
 0xf2a   : > { %v708_v22 = vshrl.u32 %v706_v21, 16  ;;  %v707_v23 = vand.u32 65535, %v706_v21 }
 0xf2c   : > { %v710_v24 = vcvt.s32.f32 %v708_v22  ;;  %v709_v25 = vcvt.s32.f32 %v707_v23 }
 0xf2e   : > { %713 = vadd.xlane.f32.xlu0 %v710_v24  ;;  %711 = vadd.xlane.f32.xlu1 %v709_v25 }
 0xfb7   : > { %v714_v26 = vpop.xlane.xlu0 %713  ;;  %v712_v27 = vpop.xlane.xlu1 %711 }
 0xfb8   : > { %v716_v28 = vcvt.f32.s32 %v714_v26  ;;  %v715_v30 = vcvt.f32.s32 %v712_v27 }
 0xfba   : > { %v717_v29 = vshll.u32 %v716_v28, 16 }
 0xfbc   : > { %v718_v31 = vadd.s32 %v717_v29, %v715_v30 }
 0xfbe   : > { %vm719_vm1 = vcmp.le.s32.totalorder %v718_v31, 178 }
 0xfbf   : > { %v720_v32 = vsel %vm719_vm1, %v698_v15, %v697_v14 }
 0xfc0   : > { %v721_v33 = vor.u32 64, %v720_v32 }
 0xfc2   : > { %v722_v34 = vxor.u32 2147483648, %v721_v33 }
 0xfc4   : > { %vm723_vm3 = vcmp.lt.s32.totalorder %v1207_v9, %v722_v34  ;;  %vm724_vm4 = vcmp.lt.s32.totalorder %v1209_v10, %v722_v34 }
 0xfc5   : > { %v725_v35 = vsel %vm723_vm3, 1, %v1114_v11  ;;  %v726_v36 = vsel %vm724_vm4, 1, %v1114_v11 }
 0xfc6   : > { %v727_v37 = vsel %vm151_vm2, %v725_v35, 0  ;;  %v728_v38 = vsel %vm151_vm2, %v726_v36, 0 }
 0xfc7   : > { %v729_v39 = vadd.s32 %v728_v38, %v727_v37 }
 0xfc9   : > { %v731_v40 = vshrl.u32 %v729_v39, 16  ;;  %v730_v41 = vand.u32 65535, %v729_v39 }
 0xfcb   : > { %v733_v42 = vcvt.s32.f32 %v731_v40  ;;  %v732_v43 = vcvt.s32.f32 %v730_v41 }
 0xfcd   : > { %736 = vadd.xlane.f32.xlu0 %v733_v42  ;;  %734 = vadd.xlane.f32.xlu1 %v732_v43 }
0x1056   : > { %v737_v44 = vpop.xlane.xlu0 %736  ;;  %v735_v45 = vpop.xlane.xlu1 %734 }
0x1057   : > { %v739_v46 = vcvt.f32.s32 %v737_v44  ;;  %v738_v48 = vcvt.f32.s32 %v735_v45 }
0x1059   : > { %v740_v47 = vshll.u32 %v739_v46, 16 }
0x105b   : > { %v741_v49 = vadd.s32 %v740_v47, %v738_v48 }
0x105d   : > { %vm742_vm5 = vcmp.le.s32.totalorder %v741_v49, 178 }
0x105e   : > { %v743_v50 = vsel %vm742_vm5, %v721_v33, %v720_v32 }
0x105f   : > { %v744_v51 = vor.u32 32, %v743_v50 }
0x1061   : > { %v745_v52 = vxor.u32 2147483648, %v744_v51 }
0x1063   : > { %vm746_vm6 = vcmp.lt.s32.totalorder %v1207_v9, %v745_v52  ;;  %vm747_vm7 = vcmp.lt.s32.totalorder %v1209_v10, %v745_v52 }
0x1064   : > { %v748_v53 = vsel %vm746_vm6, 1, %v1114_v11  ;;  %v749_v54 = vsel %vm747_vm7, 1, %v1114_v11 }
0x1065   : > { %v750_v55 = vsel %vm151_vm2, %v748_v53, 0  ;;  %v751_v56 = vsel %vm151_vm2, %v749_v54, 0 }
0x1066   : > { %v752_v57 = vadd.s32 %v751_v56, %v750_v55 }
0x1068   : > { %v754_v58 = vshrl.u32 %v752_v57, 16  ;;  %v753_v59 = vand.u32 65535, %v752_v57 }
0x106a   : > { %v756_v60 = vcvt.s32.f32 %v754_v58  ;;  %v755_v61 = vcvt.s32.f32 %v753_v59 }
0x106c   : > { %759 = vadd.xlane.f32.xlu0 %v756_v60  ;;  %757 = vadd.xlane.f32.xlu1 %v755_v61 }
0x10f5   : > { %v760_v62 = vpop.xlane.xlu0 %759  ;;  %v758_v63 = vpop.xlane.xlu1 %757 }
0x10f6   : > { %v762_v0 = vcvt.f32.s32 %v760_v62  ;;  %v761_v2 = vcvt.f32.s32 %v758_v63 }
0x10f8   : > { %v763_v1 = vshll.u32 %v762_v0, 16 }
0x10fa   : > { %v764_v3 = vadd.s32 %v763_v1, %v761_v2 }
0x10fc   : > { %vm765_vm8 = vcmp.le.s32.totalorder %v764_v3, 178 }
0x10fd   : > { %v766_v4 = vsel %vm765_vm8, %v744_v51, %v743_v50 }
0x10fe   : > { %v767_v5 = vor.u32 16, %v766_v4 }
0x1100   : > { %v768_v6 = vxor.u32 2147483648, %v767_v5 }
0x1102   : > { %vm769_vm9 = vcmp.lt.s32.totalorder %v1207_v9, %v768_v6  ;;  %vm770_vm10 = vcmp.lt.s32.totalorder %v1209_v10, %v768_v6 }
0x1103   : > { %v771_v7 = vsel %vm769_vm9, 1, %v1114_v11  ;;  %v772_v8 = vsel %vm770_vm10, 1, %v1114_v11 }
0x1104   : > { %v773_v12 = vsel %vm151_vm2, %v771_v7, 0  ;;  %v774_v13 = vsel %vm151_vm2, %v772_v8, 0 }
0x1105   : > { %v775_v14 = vadd.s32 %v774_v13, %v773_v12 }
0x1107   : > { %v777_v15 = vshrl.u32 %v775_v14, 16  ;;  %v776_v16 = vand.u32 65535, %v775_v14 }
0x1109   : > { %v779_v17 = vcvt.s32.f32 %v777_v15  ;;  %v778_v18 = vcvt.s32.f32 %v776_v16 }
0x110b   : > { %782 = vadd.xlane.f32.xlu0 %v779_v17  ;;  %780 = vadd.xlane.f32.xlu1 %v778_v18 }
0x1194   : > { %v783_v19 = vpop.xlane.xlu0 %782  ;;  %v781_v20 = vpop.xlane.xlu1 %780 }
0x1195   : > { %v785_v21 = vcvt.f32.s32 %v783_v19  ;;  %v784_v23 = vcvt.f32.s32 %v781_v20 }
0x1197   : > { %v786_v22 = vshll.u32 %v785_v21, 16 }
0x1199   : > { %v787_v24 = vadd.s32 %v786_v22, %v784_v23 }
0x119b   : > { %vm788_vm11 = vcmp.le.s32.totalorder %v787_v24, 178 }
0x119c   : > { %v789_v25 = vsel %vm788_vm11, %v767_v5, %v766_v4 }
0x119d   : > { %v790_v26 = vor.u32 8, %v789_v25 }
0x119f   : > { %v791_v27 = vxor.u32 2147483648, %v790_v26 }
0x11a1   : > { %vm792_vm12 = vcmp.lt.s32.totalorder %v1207_v9, %v791_v27  ;;  %vm793_vm13 = vcmp.lt.s32.totalorder %v1209_v10, %v791_v27 }
0x11a2   : > { %v794_v28 = vsel %vm792_vm12, 1, %v1114_v11  ;;  %v795_v29 = vsel %vm793_vm13, 1, %v1114_v11 }
0x11a3   : > { %v796_v30 = vsel %vm151_vm2, %v794_v28, 0  ;;  %v797_v31 = vsel %vm151_vm2, %v795_v29, 0 }
0x11a4   : > { %v798_v32 = vadd.s32 %v797_v31, %v796_v30 }
0x11a6   : > { %v800_v33 = vshrl.u32 %v798_v32, 16  ;;  %v799_v34 = vand.u32 65535, %v798_v32 }
0x11a8   : > { %v802_v35 = vcvt.s32.f32 %v800_v33  ;;  %v801_v36 = vcvt.s32.f32 %v799_v34 }
0x11aa   : > { %805 = vadd.xlane.f32.xlu0 %v802_v35  ;;  %803 = vadd.xlane.f32.xlu1 %v801_v36 }
0x1233   : > { %v806_v37 = vpop.xlane.xlu0 %805  ;;  %v804_v38 = vpop.xlane.xlu1 %803 }
0x1234   : > { %v808_v39 = vcvt.f32.s32 %v806_v37  ;;  %v807_v41 = vcvt.f32.s32 %v804_v38 }
0x1236   : > { %v809_v40 = vshll.u32 %v808_v39, 16 }
0x1238   : > { %v810_v42 = vadd.s32 %v809_v40, %v807_v41 }
0x123a   : > { %vm811_vm14 = vcmp.le.s32.totalorder %v810_v42, 178 }
0x123b   : > { %v812_v43 = vsel %vm811_vm14, %v790_v26, %v789_v25 }
0x123c   : > { %v813_v44 = vor.u32 4, %v812_v43 }
0x123e   : > { %v814_v45 = vxor.u32 2147483648, %v813_v44 }
0x1240   : > { %vm815_vm15 = vcmp.lt.s32.totalorder %v1207_v9, %v814_v45  ;;  %vm816_vm0 = vcmp.lt.s32.totalorder %v1209_v10, %v814_v45 }
0x1241   : > { %v817_v46 = vsel %vm815_vm15, 1, %v1114_v11  ;;  %v818_v47 = vsel %vm816_vm0, 1, %v1114_v11 }
0x1242   : > { %v819_v48 = vsel %vm151_vm2, %v817_v46, 0  ;;  %v820_v49 = vsel %vm151_vm2, %v818_v47, 0 }
0x1243   : > { %v821_v50 = vadd.s32 %v820_v49, %v819_v48 }
0x1245   : > { %v823_v51 = vshrl.u32 %v821_v50, 16  ;;  %v822_v52 = vand.u32 65535, %v821_v50 }
0x1247   : > { %v825_v53 = vcvt.s32.f32 %v823_v51  ;;  %v824_v54 = vcvt.s32.f32 %v822_v52 }
0x1249   : > { %828 = vadd.xlane.f32.xlu0 %v825_v53  ;;  %826 = vadd.xlane.f32.xlu1 %v824_v54 }
0x12d2   : > { %v829_v55 = vpop.xlane.xlu0 %828  ;;  %v827_v56 = vpop.xlane.xlu1 %826 }
0x12d3   : > { %v831_v57 = vcvt.f32.s32 %v829_v55  ;;  %v830_v59 = vcvt.f32.s32 %v827_v56 }
0x12d5   : > { %v832_v58 = vshll.u32 %v831_v57, 16 }
0x12d7   : > { %v833_v60 = vadd.s32 %v832_v58, %v830_v59 }
0x12d9   : > { %vm834_vm1 = vcmp.le.s32.totalorder %v833_v60, 178 }
0x12da   : > { %v835_v61 = vsel %vm834_vm1, %v813_v44, %v812_v43  ;;  %vm937_vm1 = vcmask 0  }
0x12db   : > { %v836_v62 = vor.u32 2, %v835_v61 }
0x12dd   : > { %v837_v63 = vxor.u32 2147483648, %v836_v62 }
0x12df   : > { %vm838_vm3 = vcmp.lt.s32.totalorder %v1207_v9, %v837_v63  ;;  %vm839_vm4 = vcmp.lt.s32.totalorder %v1209_v10, %v837_v63 }
0x12e0   : > { %v840_v0 = vsel %vm838_vm3, 1, %v1114_v11  ;;  %v841_v1 = vsel %vm839_vm4, 1, %v1114_v11 }
0x12e1   : > { %v842_v2 = vsel %vm151_vm2, %v840_v0, 0  ;;  %v843_v3 = vsel %vm151_vm2, %v841_v1, 0 }
0x12e2   : > { %v844_v4 = vadd.s32 %v843_v3, %v842_v2 }
0x12e4   : > { %v846_v5 = vshrl.u32 %v844_v4, 16  ;;  %v845_v6 = vand.u32 65535, %v844_v4 }
0x12e6   : > { %v848_v7 = vcvt.s32.f32 %v846_v5  ;;  %v847_v8 = vcvt.s32.f32 %v845_v6 }
0x12e8   : > { %851 = vadd.xlane.f32.xlu0 %v848_v7  ;;  %849 = vadd.xlane.f32.xlu1 %v847_v8 }
0x1371   : > { %v852_v12 = vpop.xlane.xlu0 %851  ;;  %v850_v13 = vpop.xlane.xlu1 %849 }
0x1372   : > { %v854_v14 = vcvt.f32.s32 %v852_v12  ;;  %v853_v16 = vcvt.f32.s32 %v850_v13 }
0x1374   : > { %v855_v15 = vshll.u32 %v854_v14, 16 }
0x1376   : > { %v856_v17 = vadd.s32 %v855_v15, %v853_v16 }
0x1378   : > { %vm857_vm5 = vcmp.le.s32.totalorder %v856_v17, 178 }
0x1379   : > { %v858_v18 = vsel %vm857_vm5, %v836_v62, %v835_v61 }
0x137a   : > { %v859_v19 = vor.u32 1, %v858_v18 }
0x137c   : > { %v860_v20 = vxor.u32 2147483648, %v859_v19 }
0x137e   : > { %vm861_vm6 = vcmp.lt.s32.totalorder %v1207_v9, %v860_v20  ;;  %vm862_vm7 = vcmp.lt.s32.totalorder %v1209_v10, %v860_v20 }
0x137f   : > { %v863_v21 = vsel %vm861_vm6, 1, %v1114_v11  ;;  %v864_v22 = vsel %vm862_vm7, 1, %v1114_v11 }
0x1380   : > { %v865_v23 = vsel %vm151_vm2, %v863_v21, 0  ;;  %v866_v24 = vsel %vm151_vm2, %v864_v22, 0 }
0x1381   : > { %v867_v25 = vadd.s32 %v866_v24, %v865_v23 }
0x1383   : > { %v869_v26 = vshrl.u32 %v867_v25, 16  ;;  %v868_v27 = vand.u32 65535, %v867_v25 }
0x1385   : > { %v871_v28 = vcvt.s32.f32 %v869_v26  ;;  %v870_v29 = vcvt.s32.f32 %v868_v27 }
0x1387   : > { %874 = vadd.xlane.f32.xlu0 %v871_v28  ;;  %872 = vadd.xlane.f32.xlu1 %v870_v29 }
0x1410   : > { %v875_v30 = vpop.xlane.xlu0 %874  ;;  %v873_v31 = vpop.xlane.xlu1 %872 }
0x1411   : > { %v877_v32 = vcvt.f32.s32 %v875_v30  ;;  %v876_v34 = vcvt.f32.s32 %v873_v31 }
0x1413   : > { %v878_v33 = vshll.u32 %v877_v32, 16 }
0x1415   : > { %v879_v35 = vadd.s32 %v878_v33, %v876_v34 }
0x1417   : > { %vm880_vm8 = vcmp.le.s32.totalorder %v879_v35, 178 }
0x1418   : > { %v881_v36 = vsel %vm880_vm8, %v859_v19, %v858_v18 }
0x1419   : > { %v882_v37 = vxor.u32 2147483648, %v881_v36 }
0x141b   : > { %vm906_vm9 = vcmp.gt.s32.totalorder %v1207_v9, %v882_v37  ;;  %vm907_vm10 = vcmp.gt.s32.totalorder %v1209_v10, %v882_v37  ;;  %vm887_vm11 = vcmp.le.s32.totalorder %v1207_v9, %v882_v37  ;;  %vm888_vm12 = vcmp.le.s32.totalorder %v1209_v10, %v882_v37 }
0x141c   : > { %v908_v38 = vsel %vm906_vm9, %v1207_v9, 2147483647  ;;  %v909_v39 = vsel %vm907_vm10, %v1209_v10, 2147483647  ;;  %v889_v40 = vsel %vm887_vm11, 1, %v1114_v11  ;;  %v890_v41 = vsel %vm888_vm12, 1, %v1114_v11 }
0x141d   : > { %v910_v42 = vsel %vm151_vm2, %v908_v38, 2147483647  ;;  %v911_v43 = vsel %vm151_vm2, %v909_v39, 2147483647  ;;  %v891_v44 = vsel %vm151_vm2, %v889_v40, 0  ;;  %v892_v45 = vsel %vm151_vm2, %v890_v41, 0 }
0x141e   : > { %vm912_vm13 = vcmp.lt.s32.totalorder %v910_v42, %v911_v43  ;;  %v893_v46 = vadd.s32 %v892_v45, %v891_v44  ;;  %v884_v2 = vxor.u32 2147483647, %v882_v37  ;;  %vm883_vm15 = vcmp.lt.s32.totalorder %v882_v37, 0 }
0x141f   : > { %v913_v47 = vsel %vm912_vm13, %v910_v42, %v911_v43 }
0x1420   : > { %v915_v48 = vshra.s32 %v913_v47, 16  ;;  %v895_v49 = vshrl.u32 %v893_v46, 16  ;;  %v894_v10 = vand.u32 65535, %v893_v46  ;;  %v914_v11 = vand.u32 65535, %v913_v47 }
0x1421   : > { %v885_v5 = vsel %vm883_vm15, %v884_v2, %v882_v37 }
0x1422   : > { %v917_v9 = vcvt.s32.f32 %v915_v48  ;;  %v897_v50 = vcvt.s32.f32 %v895_v49  ;;  %v896_v51 = vcvt.s32.f32 %v894_v10  ;;  %v916_v53 = vcvt.s32.f32 %v914_v11 }
0x1424   : > { %918 = vmin.xlane.f32.xlu0 %v917_v9  ;;  %900 = vadd.xlane.f32.xlu1 %v897_v50 }
0x1428   : > { %898 = vadd.xlane.f32.xlu0 %v896_v51 }
0x14ad   : > { %v919_v52 = vpop.xlane.xlu0 %918  ;;  %v901_v55 = vpop.xlane.xlu1 %900 }
0x14ae   : > { %vm920_vm14 = vcmp.eq.f32.partialorder %v917_v9, %v919_v52  ;;  %v903_v57 = vcvt.f32.s32 %v901_v55  ;;  %v925_v59 = vcvt.f32.s32 %v919_v52 }
0x14af   : > { %v921_v54 = vsel %vm920_vm14, %v916_v53, inf }
0x14b0   : > { %922 = vmin.xlane.f32.xlu1 %v921_v54  ;;  %v904_v60 = vshll.u32 %v903_v57, 16  ;;  %v926_v63 = vshll.u32 %v925_v59, 16 }
0x14b1   : > { %v899_v56 = vpop.xlane.xlu0 %898 }
0x14b2   : > { %v902_v58 = vcvt.f32.s32 %v899_v56 }
0x14b4   : > { %v905_v61 = vadd.s32 %v904_v60, %v902_v58 }
0x14b6   : > { %vm928_vm2 = vcmp.ge.s32.totalorder %v905_v61, 180 }
0x1539   : > { %v923_v62 = vpop.xlane.xlu1 %922 }
0x153a   : > { %v924_v0 = vcvt.f32.s32 %v923_v62 }
0x153c   : > { %v927_v1 = vadd.s32 %v926_v63, %v924_v0 }
0x153e   : > { %v929_v3 = vsel %vm928_vm2, %v882_v37, %v927_v1 }
0x153f   : > { %vm930_vm0 = vcmp.lt.s32.totalorder %v929_v3, 0  ;;  %v931_v4 = vxor.u32 2147483647, %v929_v3 }
0x1541   : > { %v932_v6 = vsel %vm930_vm0, %v931_v4, %v929_v3 }
0x1542   : > { %v934_v7 = vsub.f32 %v932_v6, %v885_v5 }
0x1544   : > { %v935_v8 = vmul.f32 0.5, %v934_v7 }
0x1546   : > { %v936_v12 = vadd.f32 %v935_v8, %v885_v5 }
0x1548   : > { %938 = vst.msk [vmem:[%s130_s18] sm:$0x1] %vm937_vm1, %v936_v12 }
0x1549 PF: > { %p11_p8 = scmp.ge.s32.totalorder %s1147_s11, 4   ;;  %s1442_s6 = smov %s1103_s7 }
0x154a   : > { %s1443_s7 = smov %s1107_s8  ;;  %s1444_s8 = smov %s1157_s14 }
0x154b   : > { %s1445_s9 = smov %s1147_s11  ;;  %13 = sbr.rel (!%p11_p8) target bundleno = 3 (0x3), region = 64 }
0x1550   :  { %956 = vsyncpa [#allocation3], 1 }
0x1551   :  { %958 = vsyncpa [#allocation3 + $0x1], 1 }

</bundles_post_ra>
